<compile_context>
chip_gen: v6e
topology: v6e:2x2x1
jax: 0.10.0
libtpu: 0.0.40
codegen_flags: <defaults>
</compile_context>

<pallas_src>
import jax
import jax.numpy as jnp
from jax.experimental import pallas as pl
from jax.experimental.pallas import tpu as pltpu

# ---- synthetic CLIP-text config (small) ----
B, S, D = 2, 8, 32          # batch, seq len, hidden size
H = 2                        # attention heads
HD = D // H                  # head dim
FF = 4 * D                   # MLP intermediate
VOCAB = 64                   # vocab size (EOS = VOCAB - 1, largest id)
PROJ = 32                    # text projection dim
NLAYERS = 2
EPS = 1e-5                   # CLIP LayerNorm eps
NEG = -1e30                  # causal-mask additive value

BB = B                       # batch rows per grid block (full batch at this size)


def _layernorm(x, g, b):
    mu = jnp.mean(x, axis=-1, keepdims=True)
    var = jnp.mean((x - mu) ** 2, axis=-1, keepdims=True)
    return (x - mu) * jax.lax.rsqrt(var + EPS) * g + b


# ---------------- fused encoder kernel: all layers + head ----------------
def encoder_kernel(
        x_emb_ref, onehot_ref,
        ln1g_ref, ln1b_ref, wqkv_ref, bqkv_ref, wo_ref, bo_ref,
        ln2g_ref, ln2b_ref, w1_ref, b1_ref, w2_ref, b2_ref,
        lnfg_ref, lnfb_ref, proj_ref,
        out_ref,
        x_scr, mask_scr):
    l = pl.program_id(1)

    # first layer of each batch block: load residual stream + build causal mask once
    @pl.when(l == 0)
    def _init():
        x_scr[...] = x_emb_ref[...].astype(jnp.float32)
        row = jax.lax.broadcasted_iota(jnp.int32, (S, S), 0)
        col = jax.lax.broadcasted_iota(jnp.int32, (S, S), 1)
        mask_scr[...] = jnp.where(col > row, NEG, 0.0).astype(jnp.float32)

    x = x_scr[...]                                             # [BB, S, D] f32

    # --- self-attention sublayer ---
    h = _layernorm(x, ln1g_ref[0], ln1b_ref[0])
    # fused QKV projection (query scale already folded into Wq/bq)
    qkv = jnp.einsum('bsd,de->bse', h.astype(jnp.bfloat16), wqkv_ref[0],
                     preferred_element_type=jnp.float32) + bqkv_ref[0]
    q = qkv[:, :, 0:D]
    k = qkv[:, :, D:2 * D]
    v = qkv[:, :, 2 * D:3 * D]

    # stack heads along the batch axis -> a single batched einsum covers all heads
    qs = jnp.concatenate([q[:, :, i * HD:(i + 1) * HD] for i in range(H)], axis=0)
    ks = jnp.concatenate([k[:, :, i * HD:(i + 1) * HD] for i in range(H)], axis=0)
    vs = jnp.concatenate([v[:, :, i * HD:(i + 1) * HD] for i in range(H)], axis=0)

    s = jnp.einsum('bqd,bkd->bqk', qs.astype(jnp.bfloat16), ks.astype(jnp.bfloat16),
                   preferred_element_type=jnp.float32)          # [H*BB, S, S]
    s = s + mask_scr[...][None, :, :]
    s = s - jnp.max(s, axis=-1, keepdims=True)
    p = jnp.exp(s)
    p = p * pl.reciprocal(jnp.sum(p, axis=-1, keepdims=True), approx=True)
    ctx = jnp.einsum('bqk,bkd->bqd', p.astype(jnp.bfloat16), vs.astype(jnp.bfloat16),
                     preferred_element_type=jnp.float32)        # [H*BB, S, HD]
    ctx = jnp.concatenate([ctx[i * BB:(i + 1) * BB] for i in range(H)], axis=-1)

    # single output projection over the full hidden dim (K = D)
    attn = jnp.einsum('bsd,de->bse', ctx.astype(jnp.bfloat16), wo_ref[0],
                      preferred_element_type=jnp.float32) + bo_ref[0]
    x = x + attn

    # --- MLP sublayer (quickGELU) ---
    h2 = _layernorm(x, ln2g_ref[0], ln2b_ref[0])
    f = jnp.einsum('bsd,df->bsf', h2.astype(jnp.bfloat16), w1_ref[0],
                   preferred_element_type=jnp.float32) + b1_ref[0]
    f = f * jax.nn.sigmoid(1.702 * f)                            # quick_gelu
    f = jnp.einsum('bsf,fd->bsd', f.astype(jnp.bfloat16), w2_ref[0],
                   preferred_element_type=jnp.float32) + b2_ref[0]
    x = x + f
    x_scr[...] = x

    # --- final LN + EOS pooling + projection + L2 normalize (last layer only) ---
    @pl.when(l == NLAYERS - 1)
    def _head():
        hf = _layernorm(x, lnfg_ref[...], lnfb_ref[...])
        pooled = jnp.sum(onehot_ref[...][:, :, None] * hf, axis=1)        # [BB, D]
        feat = jnp.dot(pooled.astype(jnp.bfloat16), proj_ref[...],
                       preferred_element_type=jnp.float32)                # [BB, PROJ]
        # F.normalize(p=2, dim=-1) done exactly (runs once; cost negligible)
        nrm = jnp.sqrt(jnp.sum(feat * feat, axis=-1, keepdims=True))
        out_ref[...] = feat / jnp.maximum(nrm, 1e-12)


def run_encoder(x_emb, onehot, p):
    nb = B // BB
    grid = (nb, NLAYERS)

    per_batch3 = lambda bi, l: (bi, 0, 0)
    per_batch2 = lambda bi, l: (bi, 0)
    per_layer3 = lambda bi, l: (l, 0, 0)
    const2 = lambda bi, l: (0, 0)

    in_specs = [
        pl.BlockSpec((BB, S, D), per_batch3),          # x_emb
        pl.BlockSpec((BB, S), per_batch2),             # onehot
        pl.BlockSpec((1, 1, D), per_layer3),           # ln1_g
        pl.BlockSpec((1, 1, D), per_layer3),           # ln1_b
        pl.BlockSpec((1, D, 3 * D), per_layer3),       # wqkv
        pl.BlockSpec((1, 1, 3 * D), per_layer3),       # bqkv
        pl.BlockSpec((1, D, D), per_layer3),           # wo
        pl.BlockSpec((1, 1, D), per_layer3),           # bo
        pl.BlockSpec((1, 1, D), per_layer3),           # ln2_g
        pl.BlockSpec((1, 1, D), per_layer3),           # ln2_b
        pl.BlockSpec((1, D, FF), per_layer3),          # w1
        pl.BlockSpec((1, 1, FF), per_layer3),          # b1
        pl.BlockSpec((1, FF, D), per_layer3),          # w2
        pl.BlockSpec((1, 1, D), per_layer3),           # b2
        pl.BlockSpec((1, D), const2),                  # lnf_g
        pl.BlockSpec((1, D), const2),                  # lnf_b
        pl.BlockSpec((D, PROJ), const2),               # proj
    ]
    out_spec = pl.BlockSpec((BB, PROJ), per_batch2)

    return pl.pallas_call(
        encoder_kernel,
        out_shape=jax.ShapeDtypeStruct((B, PROJ), jnp.float32),
        grid_spec=pltpu.PrefetchScalarGridSpec(
            num_scalar_prefetch=0,
            grid=grid,
            in_specs=in_specs,
            out_specs=out_spec,
            scratch_shapes=[pltpu.VMEM((BB, S, D), jnp.float32),   # residual stream
                            pltpu.VMEM((S, S), jnp.float32)]),     # causal mask
        compiler_params=pltpu.CompilerParams(
            dimension_semantics=("parallel", "arbitrary")),
    )(x_emb, onehot,
      p['ln1_g'], p['ln1_b'], p['wqkv'], p['bqkv'], p['wo'], p['bo'],
      p['ln2_g'], p['ln2_b'], p['w1'], p['b1'], p['w2'], p['b2'],
      p['lnf_g'], p['lnf_b'], p['proj'])


# ---------------- parameter construction (deterministic, synthetic) ----------------
def init_params(key):
    ks = iter(jax.random.split(key, 3 + NLAYERS * 6))

    def nrm(shape, scale=0.02):
        return (scale * jax.random.normal(next(ks), shape)).astype(jnp.float32)

    qscale = 1.0 / (HD ** 0.5)
    wqkv, bqkv, wo, bo, w1, b1, w2, b2 = ([] for _ in range(8))
    for _ in range(NLAYERS):
        wq = nrm((D, D)) * qscale        # fold 1/sqrt(HD) query scale into Wq (+bq)
        wk = nrm((D, D))
        wv = nrm((D, D))
        wqkv.append(jnp.concatenate([wq, wk, wv], axis=1))       # [D, 3D]
        bqkv.append(jnp.zeros((1, 3 * D), jnp.float32))
        wo.append(nrm((D, D)))
        bo.append(jnp.zeros((1, D), jnp.float32))
        w1.append(nrm((D, FF)))
        b1.append(jnp.zeros((1, FF), jnp.float32))
        w2.append(nrm((FF, D)))
        b2.append(jnp.zeros((1, D), jnp.float32))

    stk = lambda xs: jnp.stack(xs, axis=0)
    return {
        'tok_emb': nrm((VOCAB, D)),
        'pos_emb': nrm((S, D)),
        'ln1_g': jnp.ones((NLAYERS, 1, D), jnp.float32),
        'ln1_b': jnp.zeros((NLAYERS, 1, D), jnp.float32),
        'wqkv': stk(wqkv).astype(jnp.bfloat16),
        'bqkv': stk(bqkv),
        'wo': stk(wo).astype(jnp.bfloat16),
        'bo': stk(bo),
        'ln2_g': jnp.ones((NLAYERS, 1, D), jnp.float32),
        'ln2_b': jnp.zeros((NLAYERS, 1, D), jnp.float32),
        'w1': stk(w1).astype(jnp.bfloat16),
        'b1': stk(b1),
        'w2': stk(w2).astype(jnp.bfloat16),
        'b2': stk(b2),
        'lnf_g': jnp.ones((1, D), jnp.float32),
        'lnf_b': jnp.zeros((1, D), jnp.float32),
        'proj': nrm((D, PROJ)).astype(jnp.bfloat16),
    }


def text_encoder_forward(input_ids, params):
    # TODO(synk): CLIPTokenizer string->id tokenization has no Pallas equivalent;
    #             the kernel consumes precomputed token ids.
    # embeddings + EOS one-hot (gather/argmax are glue, done in plain JAX)
    x = jnp.take(params['tok_emb'], input_ids, axis=0) + params['pos_emb'][None, :, :]
    x = x.astype(jnp.float32)
    eos_pos = jnp.argmax(input_ids, axis=-1)                 # CLIP: EOS has largest id
    onehot = jax.nn.one_hot(eos_pos, S, dtype=jnp.float32)   # [B, S]
    return run_encoder(x, onehot, params)


if __name__ == "__main__":
    key = jax.random.PRNGKey(0)
    k_tok, k_par = jax.random.split(key)

    # synthetic "tokenized" batch: random ids in [1, VOCAB-2], EOS (=VOCAB-1) placed
    # at different positions, pad (=0) after EOS.
    ids = jax.random.randint(k_tok, (B, S), 1, VOCAB - 1)
    ids = ids.at[0, 5].set(VOCAB - 1)
    ids = ids.at[0, 6:].set(0)
    ids = ids.at[1, 7].set(VOCAB - 1)
    input_ids = ids.astype(jnp.int32)

    params = init_params(k_par)

    out = text_encoder_forward(input_ids, params)
    out = jax.block_until_ready(out)

    assert out.shape == (B, PROJ)
    # L2-normalized output: row norms must be ~1
    norms = jnp.sqrt(jnp.sum(out * out, axis=-1))
    assert bool(jnp.all(jnp.abs(norms - 1.0) < 1e-3))
    print("KERNEL_OK")
</pallas_src>

<mosaic_0001>
module attributes {stable_mosaic.version = 11 : i64} {
  func.func @encoder_kernel(%arg0: i32, %arg1: i32, %arg2: memref<2x8x32xf32, #tpu.memory_space<vmem>>, %arg3: memref<2x8xf32, #tpu.memory_space<vmem>>, %arg4: memref<1x1x32xf32, #tpu.memory_space<vmem>>, %arg5: memref<1x1x32xf32, #tpu.memory_space<vmem>>, %arg6: memref<1x32x96xbf16, #tpu.memory_space<vmem>>, %arg7: memref<1x1x96xf32, #tpu.memory_space<vmem>>, %arg8: memref<1x32x32xbf16, #tpu.memory_space<vmem>>, %arg9: memref<1x1x32xf32, #tpu.memory_space<vmem>>, %arg10: memref<1x1x32xf32, #tpu.memory_space<vmem>>, %arg11: memref<1x1x32xf32, #tpu.memory_space<vmem>>, %arg12: memref<1x32x128xbf16, #tpu.memory_space<vmem>>, %arg13: memref<1x1x128xf32, #tpu.memory_space<vmem>>, %arg14: memref<1x128x32xbf16, #tpu.memory_space<vmem>>, %arg15: memref<1x1x32xf32, #tpu.memory_space<vmem>>, %arg16: memref<1x32xf32, #tpu.memory_space<vmem>>, %arg17: memref<1x32xf32, #tpu.memory_space<vmem>>, %arg18: memref<32x32xbf16, #tpu.memory_space<vmem>>, %arg19: memref<2x32xf32, #tpu.memory_space<vmem>>, %arg20: memref<2x8x32xf32, #tpu.memory_space<vmem>>, %arg21: memref<8x8xf32, #tpu.memory_space<vmem>>) attributes {dimension_semantics = [#tpu.dimension_semantics<parallel>, #tpu.dimension_semantics<arbitrary>], iteration_bounds = array<i64: 1, 2>, scalar_prefetch = 0 : i64, scratch_operands = 2 : i64, tpu.core_type = #tpu.core_type<tc>, window_params = [{transform_indices = @transform_0, window_bounds = array<i64: 2, 8, 32>}, {transform_indices = @transform_1, window_bounds = array<i64: 2, 8>}, {transform_indices = @transform_2, window_bounds = array<i64: 1, 1, 32>}, {transform_indices = @transform_3, window_bounds = array<i64: 1, 1, 32>}, {transform_indices = @transform_4, window_bounds = array<i64: 1, 32, 96>}, {transform_indices = @transform_5, window_bounds = array<i64: 1, 1, 96>}, {transform_indices = @transform_6, window_bounds = array<i64: 1, 32, 32>}, {transform_indices = @transform_7, window_bounds = array<i64: 1, 1, 32>}, {transform_indices = @transform_8, window_bounds = array<i64: 1, 1, 32>}, {transform_indices = @transform_9, window_bounds = array<i64: 1, 1, 32>}, {transform_indices = @transform_10, window_bounds = array<i64: 1, 32, 128>}, {transform_indices = @transform_11, window_bounds = array<i64: 1, 1, 128>}, {transform_indices = @transform_12, window_bounds = array<i64: 1, 128, 32>}, {transform_indices = @transform_13, window_bounds = array<i64: 1, 1, 32>}, {pipeline_mode = #tpu.pipeline_mode<synchronous>, transform_indices = @transform_14, window_bounds = array<i64: 1, 32>}, {pipeline_mode = #tpu.pipeline_mode<synchronous>, transform_indices = @transform_15, window_bounds = array<i64: 1, 32>}, {pipeline_mode = #tpu.pipeline_mode<synchronous>, transform_indices = @transform_16, window_bounds = array<i64: 32, 32>}, {transform_indices = @transform_17, window_bounds = array<i64: 2, 32>}]} {
    %c0_i32 = arith.constant 0 : i32
    %0 = arith.cmpi eq, %arg1, %c0_i32 : i32
    %1 = arith.extui %0 : i1 to i32
    %c0_i32_0 = arith.constant 0 : i32
    %2 = arith.cmpi ne, %1, %c0_i32_0 : i32
    scf.if %2 {
      %c0_64 = arith.constant 0 : index
      %c0_65 = arith.constant 0 : index
      %c0_66 = arith.constant 0 : index
      %145 = vector.load %arg2[%c0_64, %c0_65, %c0_66] : memref<2x8x32xf32, #tpu.memory_space<vmem>>, vector<2x8x32xf32>
      %c0_67 = arith.constant 0 : index
      %c0_68 = arith.constant 0 : index
      %c0_69 = arith.constant 0 : index
      %146 = vector.load %arg20[%c0_67, %c0_68, %c0_69] : memref<2x8x32xf32, #tpu.memory_space<vmem>>, vector<2x8x32xf32>
      tpu.vector_store %arg20[%c0_67, %c0_68, %c0_69], %145 {strides = array<i32>} : memref<2x8x32xf32, #tpu.memory_space<vmem>>, vector<2x8x32xf32>,
      %147 = tpu.iota {dimensions = array<i32: 0>} : vector<8x8xi32>
      %148 = tpu.iota {dimensions = array<i32: 1>} : vector<8x8xi32>
      %149 = arith.cmpi sgt, %148, %147 : vector<8x8xi32>
      %cst_70 = arith.constant -1.000000e+30 : f32
      %cst_71 = arith.constant 0.000000e+00 : f32
      %150 = vector.broadcast %cst_70 : f32 to vector<8x8xf32>
      %151 = vector.broadcast %cst_71 : f32 to vector<8x8xf32>
      %152 = arith.select %149, %150, %151 : vector<8x8xi1>, vector<8x8xf32>
      %c0_72 = arith.constant 0 : index
      %c0_73 = arith.constant 0 : index
      %153 = vector.load %arg21[%c0_72, %c0_73] : memref<8x8xf32, #tpu.memory_space<vmem>>, vector<8x8xf32>
      tpu.vector_store %arg21[%c0_72, %c0_73], %152 {strides = array<i32>} : memref<8x8xf32, #tpu.memory_space<vmem>>, vector<8x8xf32>,
    } else {
    }
    %c0 = arith.constant 0 : index
    %c0_1 = arith.constant 0 : index
    %c0_2 = arith.constant 0 : index
    %3 = vector.load %arg20[%c0, %c0_1, %c0_2] : memref<2x8x32xf32, #tpu.memory_space<vmem>>, vector<2x8x32xf32>
    %c0_3 = arith.constant 0 : index
    %c0_4 = arith.constant 0 : index
    %c0_5 = arith.constant 0 : index
    %4 = vector.load %arg4[%c0_3, %c0_4, %c0_5] : memref<1x1x32xf32, #tpu.memory_space<vmem>>, vector<1x1x32xf32>
    %5 = vector.shape_cast %4 : vector<1x1x32xf32> to vector<1x32xf32>
    %c0_6 = arith.constant 0 : index
    %c0_7 = arith.constant 0 : index
    %c0_8 = arith.constant 0 : index
    %6 = vector.load %arg5[%c0_6, %c0_7, %c0_8] : memref<1x1x32xf32, #tpu.memory_space<vmem>>, vector<1x1x32xf32>
    %7 = vector.shape_cast %6 : vector<1x1x32xf32> to vector<1x32xf32>
    %cst = arith.constant dense<0.000000e+00> : vector<2x8xf32>
    %8 = vector.multi_reduction <add>, %3, %cst [2] : vector<2x8x32xf32> to vector<2x8xf32>
    %9 = vector.shape_cast %8 : vector<2x8xf32> to vector<2x8x1xf32>
    %cst_9 = arith.constant 3.200000e+01 : f32
    %10 = vector.broadcast %cst_9 : f32 to vector<2x8x1xf32>
    %11 = arith.divf %9, %10 : vector<2x8x1xf32>
    %12 = vector.broadcast %11 : vector<2x8x1xf32> to vector<2x8x32xf32>
    %13 = arith.subf %3, %12 : vector<2x8x32xf32>
    %14 = arith.mulf %13, %13 : vector<2x8x32xf32>
    %cst_10 = arith.constant dense<0.000000e+00> : vector<2x8xf32>
    %15 = vector.multi_reduction <add>, %14, %cst_10 [2] : vector<2x8x32xf32> to vector<2x8xf32>
    %16 = vector.shape_cast %15 : vector<2x8xf32> to vector<2x8x1xf32>
    %cst_11 = arith.constant 3.200000e+01 : f32
    %17 = vector.broadcast %cst_11 : f32 to vector<2x8x1xf32>
    %18 = arith.divf %16, %17 : vector<2x8x1xf32>
    %19 = vector.broadcast %11 : vector<2x8x1xf32> to vector<2x8x32xf32>
    %20 = arith.subf %3, %19 : vector<2x8x32xf32>
    %cst_12 = arith.constant 9.99999974E-6 : f32
    %21 = vector.broadcast %cst_12 : f32 to vector<2x8x1xf32>
    %22 = arith.addf %18, %21 : vector<2x8x1xf32>
    %23 = math.rsqrt %22 : vector<2x8x1xf32>
    %24 = vector.broadcast %23 : vector<2x8x1xf32> to vector<2x8x32xf32>
    %25 = arith.mulf %20, %24 : vector<2x8x32xf32>
    %26 = vector.shape_cast %5 : vector<1x32xf32> to vector<1x1x32xf32>
    %27 = vector.broadcast %26 : vector<1x1x32xf32> to vector<2x8x32xf32>
    %28 = arith.mulf %25, %27 : vector<2x8x32xf32>
    %29 = vector.shape_cast %7 : vector<1x32xf32> to vector<1x1x32xf32>
    %30 = vector.broadcast %29 : vector<1x1x32xf32> to vector<2x8x32xf32>
    %31 = arith.addf %28, %30 : vector<2x8x32xf32>
    %32 = arith.truncf %31 : vector<2x8x32xf32> to vector<2x8x32xbf16>
    %c0_13 = arith.constant 0 : index
    %c0_14 = arith.constant 0 : index
    %c0_15 = arith.constant 0 : index
    %33 = vector.load %arg6[%c0_13, %c0_14, %c0_15] : memref<1x32x96xbf16, #tpu.memory_space<vmem>>, vector<1x32x96xbf16>
    %34 = vector.shape_cast %33 : vector<1x32x96xbf16> to vector<32x96xbf16>
    "tpu.trace_start"() <{level = 10 : i32, message = "bsd,de->bse"}> : () -> ()
    %cst_16 = arith.constant dense<0.000000e+00> : vector<2x8x96xf32>
    %35 = tpu.matmul %32, %34, %cst_16 {dimension_numbers = #tpu.dot_dimension_numbers<[2], [0], [0, 1], [1], [0, 0, 0, 1, 1, 1], [], []>} : vector<2x8x32xbf16>, vector<32x96xbf16>, vector<2x8x96xf32> -> vector<2x8x96xf32>
    "tpu.trace_stop"() : () -> ()
    %c0_17 = arith.constant 0 : index
    %c0_18 = arith.constant 0 : index
    %c0_19 = arith.constant 0 : index
    %36 = vector.load %arg7[%c0_17, %c0_18, %c0_19] : memref<1x1x96xf32, #tpu.memory_space<vmem>>, vector<1x1x96xf32>
    %37 = vector.shape_cast %36 : vector<1x1x96xf32> to vector<1x96xf32>
    %38 = vector.shape_cast %37 : vector<1x96xf32> to vector<1x1x96xf32>
    %39 = vector.broadcast %38 : vector<1x1x96xf32> to vector<2x8x96xf32>
    %40 = arith.addf %35, %39 : vector<2x8x96xf32>
    %41 = vector.extract_strided_slice %40 {offsets = [0, 0, 0], sizes = [2, 8, 32], strides = [1, 1, 1]} : vector<2x8x96xf32> to vector<2x8x32xf32>
    %42 = vector.extract_strided_slice %40 {offsets = [0, 0, 32], sizes = [2, 8, 32], strides = [1, 1, 1]} : vector<2x8x96xf32> to vector<2x8x32xf32>
    %43 = vector.extract_strided_slice %40 {offsets = [0, 0, 64], sizes = [2, 8, 32], strides = [1, 1, 1]} : vector<2x8x96xf32> to vector<2x8x32xf32>
    %44 = vector.extract_strided_slice %41 {offsets = [0, 0, 0], sizes = [2, 8, 16], strides = [1, 1, 1]} : vector<2x8x32xf32> to vector<2x8x16xf32>
    %45 = vector.extract_strided_slice %41 {offsets = [0, 0, 16], sizes = [2, 8, 16], strides = [1, 1, 1]} : vector<2x8x32xf32> to vector<2x8x16xf32>
    %46 = tpu.concatenate %44, %45 in 0 : vector<2x8x16xf32>, vector<2x8x16xf32> -> vector<4x8x16xf32>
    %47 = vector.extract_strided_slice %42 {offsets = [0, 0, 0], sizes = [2, 8, 16], strides = [1, 1, 1]} : vector<2x8x32xf32> to vector<2x8x16xf32>
    %48 = vector.extract_strided_slice %42 {offsets = [0, 0, 16], sizes = [2, 8, 16], strides = [1, 1, 1]} : vector<2x8x32xf32> to vector<2x8x16xf32>
    %49 = tpu.concatenate %47, %48 in 0 : vector<2x8x16xf32>, vector<2x8x16xf32> -> vector<4x8x16xf32>
    %50 = vector.extract_strided_slice %43 {offsets = [0, 0, 0], sizes = [2, 8, 16], strides = [1, 1, 1]} : vector<2x8x32xf32> to vector<2x8x16xf32>
    %51 = vector.extract_strided_slice %43 {offsets = [0, 0, 16], sizes = [2, 8, 16], strides = [1, 1, 1]} : vector<2x8x32xf32> to vector<2x8x16xf32>
    %52 = tpu.concatenate %50, %51 in 0 : vector<2x8x16xf32>, vector<2x8x16xf32> -> vector<4x8x16xf32>
    %53 = arith.truncf %46 : vector<4x8x16xf32> to vector<4x8x16xbf16>
    %54 = arith.truncf %49 : vector<4x8x16xf32> to vector<4x8x16xbf16>
    "tpu.trace_start"() <{level = 10 : i32, message = "bqd,bkd->bqk"}> : () -> ()
    %cst_20 = arith.constant dense<0.000000e+00> : vector<4x8x8xf32>
    %55 = tpu.matmul %53, %54, %cst_20 {dimension_numbers = #tpu.dot_dimension_numbers<[2], [2], [1], [1], [0, 0, 0, 1, 1, 1], [0], [0]>} : vector<4x8x16xbf16>, vector<4x8x16xbf16>, vector<4x8x8xf32> -> vector<4x8x8xf32>
    "tpu.trace_stop"() : () -> ()
    %c0_21 = arith.constant 0 : index
    %c0_22 = arith.constant 0 : index
    %56 = vector.load %arg21[%c0_21, %c0_22] : memref<8x8xf32, #tpu.memory_space<vmem>>, vector<8x8xf32>
    %57 = vector.shape_cast %56 : vector<8x8xf32> to vector<1x8x8xf32>
    %58 = vector.broadcast %57 : vector<1x8x8xf32> to vector<4x8x8xf32>
    %59 = arith.addf %55, %58 : vector<4x8x8xf32>
    %cst_23 = arith.constant dense<0xFF800000> : vector<4x8xf32>
    %60 = vector.multi_reduction <maximumf>, %59, %cst_23 [2] : vector<4x8x8xf32> to vector<4x8xf32>
    %61 = vector.shape_cast %60 : vector<4x8xf32> to vector<4x8x1xf32>
    %62 = vector.broadcast %61 : vector<4x8x1xf32> to vector<4x8x8xf32>
    %63 = arith.subf %59, %62 : vector<4x8x8xf32>
    %64 = math.exp %63 : vector<4x8x8xf32>
    %cst_24 = arith.constant dense<0.000000e+00> : vector<4x8xf32>
    %65 = vector.multi_reduction <add>, %64, %cst_24 [2] : vector<4x8x8xf32> to vector<4x8xf32>
    %66 = vector.shape_cast %65 : vector<4x8xf32> to vector<4x8x1xf32>
    %67 = tpu.reciprocal %66 {approx = true} : vector<4x8x1xf32> -> vector<4x8x1xf32>
    %68 = vector.broadcast %67 : vector<4x8x1xf32> to vector<4x8x8xf32>
    %69 = arith.mulf %64, %68 : vector<4x8x8xf32>
    %70 = arith.truncf %69 : vector<4x8x8xf32> to vector<4x8x8xbf16>
    %71 = arith.truncf %52 : vector<4x8x16xf32> to vector<4x8x16xbf16>
    "tpu.trace_start"() <{level = 10 : i32, message = "bqk,bkd->bqd"}> : () -> ()
    %cst_25 = arith.constant dense<0.000000e+00> : vector<4x8x16xf32>
    %72 = tpu.matmul %70, %71, %cst_25 {dimension_numbers = #tpu.dot_dimension_numbers<[2], [1], [1], [2], [0, 0, 0, 1, 1, 2], [0], [0]>} : vector<4x8x8xbf16>, vector<4x8x16xbf16>, vector<4x8x16xf32> -> vector<4x8x16xf32>
    "tpu.trace_stop"() : () -> ()
    %73 = vector.extract_strided_slice %72 {offsets = [0, 0, 0], sizes = [2, 8, 16], strides = [1, 1, 1]} : vector<4x8x16xf32> to vector<2x8x16xf32>
    %74 = vector.extract_strided_slice %72 {offsets = [2, 0, 0], sizes = [2, 8, 16], strides = [1, 1, 1]} : vector<4x8x16xf32> to vector<2x8x16xf32>
    %75 = tpu.concatenate %73, %74 in 2 : vector<2x8x16xf32>, vector<2x8x16xf32> -> vector<2x8x32xf32>
    %76 = arith.truncf %75 : vector<2x8x32xf32> to vector<2x8x32xbf16>
    %c0_26 = arith.constant 0 : index
    %c0_27 = arith.constant 0 : index
    %c0_28 = arith.constant 0 : index
    %77 = vector.load %arg8[%c0_26, %c0_27, %c0_28] : memref<1x32x32xbf16, #tpu.memory_space<vmem>>, vector<1x32x32xbf16>
    %78 = vector.shape_cast %77 : vector<1x32x32xbf16> to vector<32x32xbf16>
    "tpu.trace_start"() <{level = 10 : i32, message = "bsd,de->bse"}> : () -> ()
    %cst_29 = arith.constant dense<0.000000e+00> : vector<2x8x32xf32>
    %79 = tpu.matmul %76, %78, %cst_29 {dimension_numbers = #tpu.dot_dimension_numbers<[2], [0], [0, 1], [1], [0, 0, 0, 1, 1, 1], [], []>} : vector<2x8x32xbf16>, vector<32x32xbf16>, vector<2x8x32xf32> -> vector<2x8x32xf32>
    "tpu.trace_stop"() : () -> ()
    %c0_30 = arith.constant 0 : index
    %c0_31 = arith.constant 0 : index
    %c0_32 = arith.constant 0 : index
    %80 = vector.load %arg9[%c0_30, %c0_31, %c0_32] : memref<1x1x32xf32, #tpu.memory_space<vmem>>, vector<1x1x32xf32>
    %81 = vector.shape_cast %80 : vector<1x1x32xf32> to vector<1x32xf32>
    %82 = vector.shape_cast %81 : vector<1x32xf32> to vector<1x1x32xf32>
    %83 = vector.broadcast %82 : vector<1x1x32xf32> to vector<2x8x32xf32>
    %84 = arith.addf %79, %83 : vector<2x8x32xf32>
    %85 = arith.addf %3, %84 : vector<2x8x32xf32>
    %c0_33 = arith.constant 0 : index
    %c0_34 = arith.constant 0 : index
    %c0_35 = arith.constant 0 : index
    %86 = vector.load %arg10[%c0_33, %c0_34, %c0_35] : memref<1x1x32xf32, #tpu.memory_space<vmem>>, vector<1x1x32xf32>
    %87 = vector.shape_cast %86 : vector<1x1x32xf32> to vector<1x32xf32>
    %c0_36 = arith.constant 0 : index
    %c0_37 = arith.constant 0 : index
    %c0_38 = arith.constant 0 : index
    %88 = vector.load %arg11[%c0_36, %c0_37, %c0_38] : memref<1x1x32xf32, #tpu.memory_space<vmem>>, vector<1x1x32xf32>
    %89 = vector.shape_cast %88 : vector<1x1x32xf32> to vector<1x32xf32>
    %cst_39 = arith.constant dense<0.000000e+00> : vector<2x8xf32>
    %90 = vector.multi_reduction <add>, %85, %cst_39 [2] : vector<2x8x32xf32> to vector<2x8xf32>
    %91 = vector.shape_cast %90 : vector<2x8xf32> to vector<2x8x1xf32>
    %cst_40 = arith.constant 3.200000e+01 : f32
    %92 = vector.broadcast %cst_40 : f32 to vector<2x8x1xf32>
    %93 = arith.divf %91, %92 : vector<2x8x1xf32>
    %94 = vector.broadcast %93 : vector<2x8x1xf32> to vector<2x8x32xf32>
    %95 = arith.subf %85, %94 : vector<2x8x32xf32>
    %96 = arith.mulf %95, %95 : vector<2x8x32xf32>
    %cst_41 = arith.constant dense<0.000000e+00> : vector<2x8xf32>
    %97 = vector.multi_reduction <add>, %96, %cst_41 [2] : vector<2x8x32xf32> to vector<2x8xf32>
    %98 = vector.shape_cast %97 : vector<2x8xf32> to vector<2x8x1xf32>
    %cst_42 = arith.constant 3.200000e+01 : f32
    %99 = vector.broadcast %cst_42 : f32 to vector<2x8x1xf32>
    %100 = arith.divf %98, %99 : vector<2x8x1xf32>
    %101 = vector.broadcast %93 : vector<2x8x1xf32> to vector<2x8x32xf32>
    %102 = arith.subf %85, %101 : vector<2x8x32xf32>
    %cst_43 = arith.constant 9.99999974E-6 : f32
    %103 = vector.broadcast %cst_43 : f32 to vector<2x8x1xf32>
    %104 = arith.addf %100, %103 : vector<2x8x1xf32>
    %105 = math.rsqrt %104 : vector<2x8x1xf32>
    %106 = vector.broadcast %105 : vector<2x8x1xf32> to vector<2x8x32xf32>
    %107 = arith.mulf %102, %106 : vector<2x8x32xf32>
    %108 = vector.shape_cast %87 : vector<1x32xf32> to vector<1x1x32xf32>
    %109 = vector.broadcast %108 : vector<1x1x32xf32> to vector<2x8x32xf32>
    %110 = arith.mulf %107, %109 : vector<2x8x32xf32>
    %111 = vector.shape_cast %89 : vector<1x32xf32> to vector<1x1x32xf32>
    %112 = vector.broadcast %111 : vector<1x1x32xf32> to vector<2x8x32xf32>
    %113 = arith.addf %110, %112 : vector<2x8x32xf32>
    %114 = arith.truncf %113 : vector<2x8x32xf32> to vector<2x8x32xbf16>
    %c0_44 = arith.constant 0 : index
    %c0_45 = arith.constant 0 : index
    %c0_46 = arith.constant 0 : index
    %115 = vector.load %arg12[%c0_44, %c0_45, %c0_46] : memref<1x32x128xbf16, #tpu.memory_space<vmem>>, vector<1x32x128xbf16>
    %116 = vector.shape_cast %115 : vector<1x32x128xbf16> to vector<32x128xbf16>
    "tpu.trace_start"() <{level = 10 : i32, message = "bsd,df->bsf"}> : () -> ()
    %cst_47 = arith.constant dense<0.000000e+00> : vector<2x8x128xf32>
    %117 = tpu.matmul %114, %116, %cst_47 {dimension_numbers = #tpu.dot_dimension_numbers<[2], [0], [0, 1], [1], [0, 0, 0, 1, 1, 1], [], []>} : vector<2x8x32xbf16>, vector<32x128xbf16>, vector<2x8x128xf32> -> vector<2x8x128xf32>
    "tpu.trace_stop"() : () -> ()
    %c0_48 = arith.constant 0 : index
    %c0_49 = arith.constant 0 : index
    %c0_50 = arith.constant 0 : index
    %118 = vector.load %arg13[%c0_48, %c0_49, %c0_50] : memref<1x1x128xf32, #tpu.memory_space<vmem>>, vector<1x1x128xf32>
    %119 = vector.shape_cast %118 : vector<1x1x128xf32> to vector<1x128xf32>
    %120 = vector.shape_cast %119 : vector<1x128xf32> to vector<1x1x128xf32>
    %121 = vector.broadcast %120 : vector<1x1x128xf32> to vector<2x8x128xf32>
    %122 = arith.addf %117, %121 : vector<2x8x128xf32>
    %cst_51 = arith.constant 1.702000e+00 : f32
    %123 = vector.broadcast %cst_51 : f32 to vector<2x8x128xf32>
    %124 = arith.mulf %123, %122 : vector<2x8x128xf32>
    %125 = arith.negf %124 : vector<2x8x128xf32>
    %126 = math.exp %125 : vector<2x8x128xf32>
    %cst_52 = arith.constant 1.000000e+00 : f32
    %127 = vector.broadcast %cst_52 : f32 to vector<2x8x128xf32>
    %128 = arith.addf %127, %126 : vector<2x8x128xf32>
    %129 = arith.divf %127, %128 : vector<2x8x128xf32>
    %130 = arith.mulf %122, %129 : vector<2x8x128xf32>
    %131 = arith.truncf %130 : vector<2x8x128xf32> to vector<2x8x128xbf16>
    %c0_53 = arith.constant 0 : index
    %c0_54 = arith.constant 0 : index
    %c0_55 = arith.constant 0 : index
    %132 = vector.load %arg14[%c0_53, %c0_54, %c0_55] : memref<1x128x32xbf16, #tpu.memory_space<vmem>>, vector<1x128x32xbf16>
    %133 = vector.shape_cast %132 : vector<1x128x32xbf16> to vector<128x32xbf16>
    "tpu.trace_start"() <{level = 10 : i32, message = "bsf,fd->bsd"}> : () -> ()
    %cst_56 = arith.constant dense<0.000000e+00> : vector<2x8x32xf32>
    %134 = tpu.matmul %131, %133, %cst_56 {dimension_numbers = #tpu.dot_dimension_numbers<[2], [0], [0, 1], [1], [0, 0, 0, 1, 1, 1], [], []>} : vector<2x8x128xbf16>, vector<128x32xbf16>, vector<2x8x32xf32> -> vector<2x8x32xf32>
    "tpu.trace_stop"() : () -> ()
    %c0_57 = arith.constant 0 : index
    %c0_58 = arith.constant 0 : index
    %c0_59 = arith.constant 0 : index
    %135 = vector.load %arg15[%c0_57, %c0_58, %c0_59] : memref<1x1x32xf32, #tpu.memory_space<vmem>>, vector<1x1x32xf32>
    %136 = vector.shape_cast %135 : vector<1x1x32xf32> to vector<1x32xf32>
    %137 = vector.shape_cast %136 : vector<1x32xf32> to vector<1x1x32xf32>
    %138 = vector.broadcast %137 : vector<1x1x32xf32> to vector<2x8x32xf32>
    %139 = arith.addf %134, %138 : vector<2x8x32xf32>
    %140 = arith.addf %85, %139 : vector<2x8x32xf32>
    %c0_60 = arith.constant 0 : index
    %c0_61 = arith.constant 0 : index
    %c0_62 = arith.constant 0 : index
    %141 = vector.load %arg20[%c0_60, %c0_61, %c0_62] : memref<2x8x32xf32, #tpu.memory_space<vmem>>, vector<2x8x32xf32>
    tpu.vector_store %arg20[%c0_60, %c0_61, %c0_62], %140 {strides = array<i32>} : memref<2x8x32xf32, #tpu.memory_space<vmem>>, vector<2x8x32xf32>,
    %c1_i32 = arith.constant 1 : i32
    %142 = arith.cmpi eq, %arg1, %c1_i32 : i32
    %143 = arith.extui %142 : i1 to i32
    %c0_i32_63 = arith.constant 0 : i32
    %144 = arith.cmpi ne, %143, %c0_i32_63 : i32
    scf.if %144 {
      %c0_64 = arith.constant 0 : index
      %c0_65 = arith.constant 0 : index
      %145 = vector.load %arg16[%c0_64, %c0_65] : memref<1x32xf32, #tpu.memory_space<vmem>>, vector<1x32xf32>
      %c0_66 = arith.constant 0 : index
      %c0_67 = arith.constant 0 : index
      %146 = vector.load %arg17[%c0_66, %c0_67] : memref<1x32xf32, #tpu.memory_space<vmem>>, vector<1x32xf32>
      %cst_68 = arith.constant dense<0.000000e+00> : vector<2x8xf32>
      %147 = vector.multi_reduction <add>, %140, %cst_68 [2] : vector<2x8x32xf32> to vector<2x8xf32>
      %148 = vector.shape_cast %147 : vector<2x8xf32> to vector<2x8x1xf32>
      %cst_69 = arith.constant 3.200000e+01 : f32
      %149 = vector.broadcast %cst_69 : f32 to vector<2x8x1xf32>
      %150 = arith.divf %148, %149 : vector<2x8x1xf32>
      %151 = vector.broadcast %150 : vector<2x8x1xf32> to vector<2x8x32xf32>
      %152 = arith.subf %140, %151 : vector<2x8x32xf32>
      %153 = arith.mulf %152, %152 : vector<2x8x32xf32>
      %cst_70 = arith.constant dense<0.000000e+00> : vector<2x8xf32>
      %154 = vector.multi_reduction <add>, %153, %cst_70 [2] : vector<2x8x32xf32> to vector<2x8xf32>
      %155 = vector.shape_cast %154 : vector<2x8xf32> to vector<2x8x1xf32>
      %cst_71 = arith.constant 3.200000e+01 : f32
      %156 = vector.broadcast %cst_71 : f32 to vector<2x8x1xf32>
      %157 = arith.divf %155, %156 : vector<2x8x1xf32>
      %158 = vector.broadcast %150 : vector<2x8x1xf32> to vector<2x8x32xf32>
      %159 = arith.subf %140, %158 : vector<2x8x32xf32>
      %cst_72 = arith.constant 9.99999974E-6 : f32
      %160 = vector.broadcast %cst_72 : f32 to vector<2x8x1xf32>
      %161 = arith.addf %157, %160 : vector<2x8x1xf32>
      %162 = math.rsqrt %161 : vector<2x8x1xf32>
      %163 = vector.broadcast %162 : vector<2x8x1xf32> to vector<2x8x32xf32>
      %164 = arith.mulf %159, %163 : vector<2x8x32xf32>
      %165 = vector.shape_cast %145 : vector<1x32xf32> to vector<1x1x32xf32>
      %166 = vector.broadcast %165 : vector<1x1x32xf32> to vector<2x8x32xf32>
      %167 = arith.mulf %164, %166 : vector<2x8x32xf32>
      %168 = vector.shape_cast %146 : vector<1x32xf32> to vector<1x1x32xf32>
      %169 = vector.broadcast %168 : vector<1x1x32xf32> to vector<2x8x32xf32>
      %170 = arith.addf %167, %169 : vector<2x8x32xf32>
      %c0_73 = arith.constant 0 : index
      %c0_74 = arith.constant 0 : index
      %171 = vector.load %arg3[%c0_73, %c0_74] : memref<2x8xf32, #tpu.memory_space<vmem>>, vector<2x8xf32>
      %172 = vector.shape_cast %171 : vector<2x8xf32> to vector<2x8x1xf32>
      %173 = vector.broadcast %172 : vector<2x8x1xf32> to vector<2x8x32xf32>
      %174 = arith.mulf %173, %170 : vector<2x8x32xf32>
      %cst_75 = arith.constant dense<0.000000e+00> : vector<2x32xf32>
      %175 = vector.multi_reduction <add>, %174, %cst_75 [1] : vector<2x8x32xf32> to vector<2x32xf32>
      %176 = arith.truncf %175 : vector<2x32xf32> to vector<2x32xbf16>
      %c0_76 = arith.constant 0 : index
      %c0_77 = arith.constant 0 : index
      %177 = vector.load %arg18[%c0_76, %c0_77] : memref<32x32xbf16, #tpu.memory_space<vmem>>, vector<32x32xbf16>
      %cst_78 = arith.constant dense<0.000000e+00> : vector<2x32xf32>
      %178 = tpu.matmul %176, %177, %cst_78 {dimension_numbers = #tpu.dot_dimension_numbers<[1], [0], [0], [1], [0, 0, 1, 1], [], []>} : vector<2x32xbf16>, vector<32x32xbf16>, vector<2x32xf32> -> vector<2x32xf32>
      %179 = arith.mulf %178, %178 : vector<2x32xf32>
      %cst_79 = arith.constant dense<0.000000e+00> : vector<2xf32>
      %180 = vector.multi_reduction <add>, %179, %cst_79 [1] : vector<2x32xf32> to vector<2xf32>
      %181 = vector.shape_cast %180 : vector<2xf32> to vector<2x1xf32>
      %182 = math.sqrt %181 : vector<2x1xf32>
      %cst_80 = arith.constant 9.99999996E-13 : f32
      %183 = vector.broadcast %cst_80 : f32 to vector<2x1xf32>
      %184 = arith.maximumf %182, %183 : vector<2x1xf32>
      %185 = vector.broadcast %184 : vector<2x1xf32> to vector<2x32xf32>
      %186 = arith.divf %178, %185 : vector<2x32xf32>
      %c0_81 = arith.constant 0 : index
      %c0_82 = arith.constant 0 : index
      %187 = vector.load %arg19[%c0_81, %c0_82] : memref<2x32xf32, #tpu.memory_space<vmem>>, vector<2x32xf32>
      tpu.vector_store %arg19[%c0_81, %c0_82], %186 {strides = array<i32>} : memref<2x32xf32, #tpu.memory_space<vmem>>, vector<2x32xf32>,
    } else {
    }
    return
  }
  func.func @transform_0(%arg0: i32, %arg1: i32) -> (i32, i32, i32) {
    %c0_i32 = arith.constant 0 : i32
    %c0_i32_0 = arith.constant 0 : i32
    %c0_i32_1 = arith.constant 0 : i32
    return %arg0, %c0_i32, %c0_i32_0 : i32, i32, i32
  }
  func.func @transform_1(%arg0: i32, %arg1: i32) -> (i32, i32) {
    %c0_i32 = arith.constant 0 : i32
    %c0_i32_0 = arith.constant 0 : i32
    return %arg0, %c0_i32 : i32, i32
  }
  func.func @transform_2(%arg0: i32, %arg1: i32) -> (i32, i32, i32) {
    %c0_i32 = arith.constant 0 : i32
    %c0_i32_0 = arith.constant 0 : i32
    %c0_i32_1 = arith.constant 0 : i32
    return %arg1, %c0_i32, %c0_i32_0 : i32, i32, i32
  }
  func.func @transform_3(%arg0: i32, %arg1: i32) -> (i32, i32, i32) {
    %c0_i32 = arith.constant 0 : i32
    %c0_i32_0 = arith.constant 0 : i32
    %c0_i32_1 = arith.constant 0 : i32
    return %arg1, %c0_i32, %c0_i32_0 : i32, i32, i32
  }
  func.func @transform_4(%arg0: i32, %arg1: i32) -> (i32, i32, i32) {
    %c0_i32 = arith.constant 0 : i32
    %c0_i32_0 = arith.constant 0 : i32
    %c0_i32_1 = arith.constant 0 : i32
    return %arg1, %c0_i32, %c0_i32_0 : i32, i32, i32
  }
  func.func @transform_5(%arg0: i32, %arg1: i32) -> (i32, i32, i32) {
    %c0_i32 = arith.constant 0 : i32
    %c0_i32_0 = arith.constant 0 : i32
    %c0_i32_1 = arith.constant 0 : i32
    return %arg1, %c0_i32, %c0_i32_0 : i32, i32, i32
  }
  func.func @transform_6(%arg0: i32, %arg1: i32) -> (i32, i32, i32) {
    %c0_i32 = arith.constant 0 : i32
    %c0_i32_0 = arith.constant 0 : i32
    %c0_i32_1 = arith.constant 0 : i32
    return %arg1, %c0_i32, %c0_i32_0 : i32, i32, i32
  }
  func.func @transform_7(%arg0: i32, %arg1: i32) -> (i32, i32, i32) {
    %c0_i32 = arith.constant 0 : i32
    %c0_i32_0 = arith.constant 0 : i32
    %c0_i32_1 = arith.constant 0 : i32
    return %arg1, %c0_i32, %c0_i32_0 : i32, i32, i32
  }
  func.func @transform_8(%arg0: i32, %arg1: i32) -> (i32, i32, i32) {
    %c0_i32 = arith.constant 0 : i32
    %c0_i32_0 = arith.constant 0 : i32
    %c0_i32_1 = arith.constant 0 : i32
    return %arg1, %c0_i32, %c0_i32_0 : i32, i32, i32
  }
  func.func @transform_9(%arg0: i32, %arg1: i32) -> (i32, i32, i32) {
    %c0_i32 = arith.constant 0 : i32
    %c0_i32_0 = arith.constant 0 : i32
    %c0_i32_1 = arith.constant 0 : i32
    return %arg1, %c0_i32, %c0_i32_0 : i32, i32, i32
  }
  func.func @transform_10(%arg0: i32, %arg1: i32) -> (i32, i32, i32) {
    %c0_i32 = arith.constant 0 : i32
    %c0_i32_0 = arith.constant 0 : i32
    %c0_i32_1 = arith.constant 0 : i32
    return %arg1, %c0_i32, %c0_i32_0 : i32, i32, i32
  }
  func.func @transform_11(%arg0: i32, %arg1: i32) -> (i32, i32, i32) {
    %c0_i32 = arith.constant 0 : i32
    %c0_i32_0 = arith.constant 0 : i32
    %c0_i32_1 = arith.constant 0 : i32
    return %arg1, %c0_i32, %c0_i32_0 : i32, i32, i32
  }
  func.func @transform_12(%arg0: i32, %arg1: i32) -> (i32, i32, i32) {
    %c0_i32 = arith.constant 0 : i32
    %c0_i32_0 = arith.constant 0 : i32
    %c0_i32_1 = arith.constant 0 : i32
    return %arg1, %c0_i32, %c0_i32_0 : i32, i32, i32
  }
  func.func @transform_13(%arg0: i32, %arg1: i32) -> (i32, i32, i32) {
    %c0_i32 = arith.constant 0 : i32
    %c0_i32_0 = arith.constant 0 : i32
    %c0_i32_1 = arith.constant 0 : i32
    return %arg1, %c0_i32, %c0_i32_0 : i32, i32, i32
  }
  func.func @transform_14(%arg0: i32, %arg1: i32) -> (i32, i32) {
    %c0_i32 = arith.constant 0 : i32
    %c0_i32_0 = arith.constant 0 : i32
    %c0_i32_1 = arith.constant 0 : i32
    return %c0_i32, %c0_i32_0 : i32, i32
  }
  func.func @transform_15(%arg0: i32, %arg1: i32) -> (i32, i32) {
    %c0_i32 = arith.constant 0 : i32
    %c0_i32_0 = arith.constant 0 : i32
    %c0_i32_1 = arith.constant 0 : i32
    return %c0_i32, %c0_i32_0 : i32, i32
  }
  func.func @transform_16(%arg0: i32, %arg1: i32) -> (i32, i32) {
    %c0_i32 = arith.constant 0 : i32
    %c0_i32_0 = arith.constant 0 : i32
    %c0_i32_1 = arith.constant 0 : i32
    return %c0_i32, %c0_i32_0 : i32, i32
  }
  func.func @transform_17(%arg0: i32, %arg1: i32) -> (i32, i32) {
    %c0_i32 = arith.constant 0 : i32
    %c0_i32_0 = arith.constant 0 : i32
    return %arg0, %c0_i32 : i32, i32
  }
}

</mosaic_0001>

<bundles_post_ra>
// kernel: tpu_custom_call.1
= control target key start
LH: loop header
LB: loop body
LE: loop exit
PB: predicated region body
PF: predicated region fallthrough
CT: control target
= control target key end

     0   :  { %s2841_s0 = inlined_call_operand.vmem [shape: f32[2,8,32], index: 0, kind: input, shape index: {}]   ;;  %s2842_s1 = inlined_call_operand.vmem [shape: f32[2,8], index: 1, kind: input, shape index: {}]   ;;  %s2843_s2 = inlined_call_operand.vmem [shape: f32[2,1,32], index: 2, kind: input, shape index: {}]   ;;  %s2844_s3 = inlined_call_operand.vmem [shape: f32[2,1,32], index: 3, kind: input, shape index: {}]   ;;  %s2845_s4 = inlined_call_operand.vmem [shape: bf16[2,32,96], index: 4, kind: input, shape index: {}]   ;;  %s2846_s5 = inlined_call_operand.vmem [shape: f32[2,1,96], index: 5, kind: input, shape index: {}]   ;;  %s2847_s6 = inlined_call_operand.vmem [shape: bf16[2,32,32], index: 6, kind: input, shape index: {}]   ;;  %s2848_s7 = inlined_call_operand.vmem [shape: f32[2,1,32], index: 7, kind: input, shape index: {}]   ;;  %s2849_s8 = inlined_call_operand.vmem [shape: f32[2,1,32], index: 8, kind: input, shape index: {}]   ;;  %s2850_s9 = inlined_call_operand.vmem [shape: f32[2,1,32], index: 9, kind: input, shape index: {}]   ;;  %s2851_s10 = inlined_call_operand.vmem [shape: bf16[2,32,128], index: 10, kind: input, shape index: {}]   ;;  %s2852_s11 = inlined_call_operand.vmem [shape: f32[2,1,128], index: 11, kind: input, shape index: {}]   ;;  %s2853_s12 = inlined_call_operand.vmem [shape: bf16[2,128,32], index: 12, kind: input, shape index: {}]   ;;  %s2854_s13 = inlined_call_operand.vmem [shape: f32[2,1,32], index: 13, kind: input, shape index: {}]   ;;  %s2855_s14 = inlined_call_operand.vmem [shape: f32[1,32], index: 14, kind: input, shape index: {}]   ;;  %s2856_s15 = inlined_call_operand.vmem [shape: f32[1,32], index: 15, kind: input, shape index: {}]   ;;  %s2857_s16 = inlined_call_operand.vmem [shape: bf16[32,32], index: 16, kind: input, shape index: {}]   ;;  %s2858_s17 = inlined_call_operand.hbm [shape: f32[2,32], index: 17, kind: output, shape index: {}]  }
   0x1   :  { %2863 = sst [smem:[#allocation10_spill]] %s2841_s0 }
   0x2   :  { %2864 = sst [smem:[#allocation11_spill]] %s2842_s1 }
   0x3   :  { %2865 = sst [smem:[#allocation12_spill]] %s2845_s4 }
   0x4   :  { %2866 = sst [smem:[#allocation13_spill]] %s2847_s6 }
   0x5   :  { %2867 = sst [smem:[#allocation14_spill]] %s2855_s14 }
   0x6   :  { %2868 = sst [smem:[#allocation15_spill]] %s2856_s15 }
   0x7   :  { %2869 = sst [smem:[#allocation16_spill]] %s2857_s16 }
   0x8   :  { %2870 = sst [smem:[#allocation17_spill]] %s2858_s17 }
   0x9   :  { %22 = vsyncpa [#allocation5], 0  ;;  %s2526_s24 = smov 0   ;;  %s2528_s25 = smov 0  }
   0xa   :  { %s2530_s26 = smov 0  }
   0xb LB: > { %2871 = sst [smem:[#allocation7_spill]] %s2420_s25  ;;  %s37_s28 = sadd.s32 1, %s2420_s25  ;;  %s2424_s26 = sphi %s2530_s26, %s28_s26   ;;  %s2420_s25 = sphi %s2528_s25, %s2891_s25   ;;  %s2416_s24 = sphi %s2526_s24, %s2890_s24  }
   0xc   : > { %2872 = sst [smem:[#allocation8_spill]] %s2424_s26  ;;  %p38_p0 = scmp.ge.s32.totalorder %s37_s28, 2 }
   0xd   : > { %p2064_p1 = scmp.ge.s32.totalorder %s2424_s26, 1  ;;  %p614_p2 = scmp.lt.s32.totalorder %s2424_s26, 3 }
   0xe   : > { %s2893_s28 = smov (%p38_p0, %s37_s28), 0 }
   0xf   : > { %2873 = sst [smem:[#allocation9_spill]] %s2893_s28  ;;  %p615_p3 = pnand %p2064_p1, %p614_p2 }
  0x10   : > { %p719_p4 = scmp.lt.s32.totalorder (!%p615_p3), %s2416_s24, 1  ;;  %s2874_s4 = sld [smem:[#allocation12_spill]] (!%p615_p3) }
  0x11   : > { %618 = sbr.rel (%p615_p3) target bundleno = 3309 (0xced), region = 88  ;;  %s2875_s6 = sld [smem:[#allocation13_spill]] (!%p615_p3) }
  0x12   : > { %p2073_p5 = scmp.ne.s32.totalorder (!%p615_p3), %s2416_s24, 0 }
  0x16   : > { %s2549_s29 = scalar_select %p719_p4, %s2416_s24, 1 }
  0x17   : > { %s2876_s0 = sld [smem:[#allocation10_spill]] (!%p2073_p5) }
  0x18   : > { %s2123_s21 = sshll.u32 %s2549_s29, 4  ;;  %s743_s14 = scalar_lea.vmem %s2849_s8, %s2549_s29 }
  0x19   : > { %s2567_s28 = scalar_lea.vmem %s2874_s4, %s2123_s21  ;;  %s2572_s26 = scalar_lea.vmem %s2875_s6, %s2123_s21 }
  0x1a   : > { %s746_s27 = scalar_lea.vmem %s2850_s9, %s2549_s29  ;;  %s2589_s4 = scalar_lea.vmem %s2851_s10, %s2123_s21 }
  0x1b   : > { %s754_s6 = scalar_lea.vmem %s2852_s11, %s2549_s29  ;;  %s2126_s16 = sshll.u32 %s2549_s29, 6 }
  0x1c   : > { %s2599_s19 = scalar_lea.vmem %s2853_s12, %s2126_s16  ;;  %s762_s22 = scalar_lea.vmem %s2854_s13, %s2549_s29 }
  0x1d   : > { %767 = sbr.rel (%p2073_p5) target bundleno = 41 (0x29), region = 92 }
  0x22   : > { %v768_v0 = vld [vmem:[%s2876_s0] sm:$0xff]  ;;  %vm770_vm0 = vcmask 261120   ;;  %v769_v1 = vld [vmem:[%s2876_s0 + $0x8] sm:$0xff]  ;;  %v773_v2 = vlaneseq  ;;  %vm779_vm1 = vcmask 64512   ;;  %v2426_v5 = vmov 0.0  }
  0x23   : > { %771 = vst.msk [vmem:[#allocation2] sm:$0xff] %vm770_vm0, %v768_v0  ;;  %772 = vst.msk [vmem:[#allocation2 + $0x8] sm:$0xff] %vm770_vm0, %v769_v1 }
  0x24   : > { %v774_v3 = vshrl.u32 %v773_v2, 7  ;;  %v776_v4 = vand.u32 127, %v773_v2 }
  0x26   : > { %vm777_vm2 = vcmp.gt.s32.totalorder %v776_v4, %v774_v3 }
  0x27   : > { %v778_v6 = vsel %vm777_vm2, -1e+30, %v2426_v5 }
  0x28   : > { %780 = vst.msk [vmem:[#allocation3] sm:$0xff] %vm779_vm1, %v778_v6 }
  0x29 PF: > { %vm785_vm3 = vcmask 261120   ;;  %v2318_v21 = vld [vmem:[%s2567_s28 + $0x8] sm:$0xff]   ;;  %v2427_v22 = vmov 0.0   ;;  %vm2428_vm4 = vmmov 0   ;;  %v2319_v23 = vld [vmem:[%s2567_s28] sm:$0xff]   ;;  %s2877_s25 = scalar_lea.vmem %s2843_s2, %s2549_s29  ;;  %s2878_s20 = scalar_lea.vmem %s2844_s3, %s2549_s29  ;;  %vm919_vm5 = vcmask 130048  }
  0x2a   : > { %v2612_v7 = vld [vmem:[#allocation2] sm:$0xff]  ;;  %v2614_v8 = vld [vmem:[#allocation2 + $0x8] sm:$0xff]  ;;  %2168 = vmatprep.subr.bf16.mxu0 %v2427_v22  ;;  %2172 = vmatprep.mubr.msk.bf16.mxu0 %vm2428_vm4, %v2427_v22  ;;  %s2879_s21 = scalar_lea.vmem %s2846_s5, %s2549_s29  ;;  %s2429_s30 = smov 96   ;;  %vm1113_vm6 = vcmask 64512   ;;  %vm1167_vm7 = vcmask 1043456  }
  0x2b   : > { %v786_v9 = vsel %vm785_vm3, %v2612_v7, 0.0  ;;  %v789_v10 = vsel %vm785_vm3, %v2614_v8, 0.0  ;;  %2169 = vmatpush3.bf16.msra.mxu0 %v2318_v21  ;;  %2188 = vmatprep.subr.bf16.mxu1 %v2427_v22  ;;  %v2074_v32 = vld [vmem:[%s2877_s25] ss:$0 sm:$0xff]  ;;  %s2430_s17 = smov 112   ;;  %s2431_s16 = smov 64  }
  0x2c   : > { %787 = vadd.xlane.f32.xlu0 %v786_v9  ;;  %2170 = vmatprep.subr.bf16.mxu0 %v2427_v22  ;;  %v2075_v36 = vld [vmem:[%s2878_s20] ss:$0 sm:$0xff]  ;;  %s2432_s28 = smov 16   ;;  %s2880_s15 = scalar_lea.vmem %s2848_s7, %s2549_s29 }
  0x2d   : > { %2190 = vmatprep.mubr.msk.bf16.mxu1 %vm2428_vm4, %v2427_v22  ;;  %v2076_v41 = vld [vmem:[%s2879_s21] ss:$0 sm:$0xff]  ;;  %p2113_p6 = scmp.ne.s32.totalorder %s2416_s24, 1 }
  0x2e   : > { %s2881_s23 = sld [smem:[#allocation11_spill]] (!%p2113_p6) }
  0x2f   : > { %2171 = vmatpush3.bf16.msra.mxu0 %v2319_v23  ;;  %v915_v0 = vld [vmem:[#allocation3] sm:$0xff]  ;;  %s2883_s25 = sld [smem:[#allocation14_spill]] (!%p2113_p6) }
  0x30   : > { %790 = vadd.xlane.f32.xlu0 %v789_v10  ;;  %2176 = vmatprep.subr.bf16.mxu0 %v2427_v22  ;;  %s2884_s20 = sld [smem:[#allocation15_spill]] (!%p2113_p6) }
  0xb5   : > { %v788_v11 = vpop.xlane.xlu0 %787 }
  0xb6   : > { %v793_v12 = vmul.f32 0.03125, %v788_v11 }
  0xb8   : > { %v795_v13 = vsub.f32 %v2612_v7, %v793_v12 }
  0xb9   : > { %v791_v14 = vpop.xlane.xlu0 %790 }
  0xba   : > { %v794_v15 = vmul.f32 0.03125, %v791_v14  ;;  %v797_v16 = vmul.f32 %v795_v13, %v795_v13 }
  0xbc   : > { %v796_v17 = vsub.f32 %v2614_v8, %v794_v15  ;;  %v799_v18 = vsel %vm785_vm3, %v797_v16, 0.0 }
  0xbd   : > { %800 = vadd.xlane.f32.xlu1 %v799_v18 }
  0xbe   : > { %v798_v19 = vmul.f32 %v796_v17, %v796_v17 }
  0xc0   : > { %v802_v20 = vsel %vm785_vm3, %v798_v19, 0.0 }
  0xc1   : > { %803 = vadd.xlane.f32.xlu1 %v802_v20 }
 0x146   : > { %v801_v24 = vpop.xlane.xlu1 %800 }
 0x147   : > { %v805_v25 = vmul.f32 0.03125, %v801_v24 }
 0x149   : > { %v807_v26 = vadd.f32 1e-05, %v805_v25 }
 0x14a   : > { %v804_v27 = vpop.xlane.xlu1 %803 }
 0x14b   : > { %2332 = vrsqrt.f32 %v807_v26  ;;  %v806_v28 = vmul.f32 0.03125, %v804_v27 }
 0x14d   : > { %v808_v29 = vadd.f32 1e-05, %v806_v28 }
 0x14f   : > { %2334 = vrsqrt.f32 %v808_v29 }
 0x158   : > { %v2333_v30 = vpop.eup %2332 }
 0x159   : > { %v811_v31 = vmul.f32 %v2333_v30, %v795_v13 }
 0x15b   : > { %v819_v35 = vmul.f32 %v2074_v32, %v811_v31 }
 0x15c   : > { %v2335_v33 = vpop.eup %2334 }
 0x15d   : > { %v812_v34 = vmul.f32 %v2335_v33, %v796_v17  ;;  %v827_v38 = vadd.f32 %v2075_v36, %v819_v35 }
 0x15f   : > { %v820_v37 = vmul.f32 %v2074_v32, %v812_v34 }
 0x161   : > { %v828_v39 = vadd.f32 %v2075_v36, %v820_v37 }
 0x163   : > { %v2127_v40 = vpack.c.bf16 %v828_v39, %v827_v38 }
 0x165   : > { %2173 = vmatmul.mubr.msk.bf16.vlgmr.msra.gmra.mxu0 %vm785_vm3, %v2127_v40 }
 0x166   : > { %2178 = vmatprep.mubr.msk.bf16.mxu0 %vm2428_vm4, %v2427_v22 }
 0x225   : > { %v896_v42 = vpop.f32.mrf.mxu0 }
 0x226   : > { %v897_v43 = vadd.f32 %v2076_v41, %v896_v42 }
 0x227   : > { %v2174_v44 = vpop.f32.mrf.mxu0 }
 0x228   : > { %v911_v45 = vpack.c.bf16 %v897_v43, %v897_v43 }
 0x229   : > { %v899_v46 = vpop.f32.mrf.mxu0 }
 0x22a   : > { %v900_v47 = vadd.f32 %v2076_v41, %v899_v46  ;;  %917 = vrot.lane.b32.xlu1 %v911_v45, %s2429_s30 }
 0x22b   : > { %v2175_v48 = vpop.f32.mrf.mxu0 }
 0x22c   : > { %v2308_v49 = vpack.i.bf16 %v900_v47, %v897_v43  ;;  %v2652_v50 = vpack.c.bf16 %v900_v47, %v900_v47 }
 0x22e   : > { %2309 = vrot.lane.b32.xlu0 %v2308_v49, %s2430_s17  ;;  %967 = vrot.lane.b32.xlu1 %v2652_v50, %s2429_s30 }
 0x29c   : > { %v918_v51 = vpop.permute.xlu1 %917 }
 0x29d   : > { %v924_v52 = vsel %vm919_vm5, %v918_v51, 0 }
 0x29e   : > { %2177 = vmatpush3.bf16.xpose.msra.mxu0 %v924_v52 }
 0x29f   : > { %2182 = vmatprep.subr.bf16.mxu0 %v2427_v22 }
 0x2a0   : > { %v2310_v53 = vpop.permute.xlu0 %2309  ;;  %v968_v56 = vpop.permute.xlu1 %967 }
 0x2a1   : > { %v2312_v54 = vunpack.i.h.bf16 %v2310_v53  ;;  %v2311_v55 = vunpack.i.l.bf16 %v2310_v53  ;;  %v973_v59 = vsel %vm919_vm5, %v968_v56, 0 }
 0x2a3   : > { %v2657_v57 = vpack.c.bf16 %v2312_v54, %v2312_v54  ;;  %v2659_v58 = vpack.c.bf16 %v2311_v55, %v2311_v55 }
 0x2a5   : > { %2179 = vmatmul.mubr.msk.bf16.vlgmr.msra.gmra.mxu0 %vm919_vm5, %v911_v45  ;;  %1065 = vrot.lane.b32.xlu0 %v2657_v57, %s2429_s30 }
 0x2a6   : > { %1016 = vrot.lane.b32.xlu1 %v2659_v58, %s2429_s30  ;;  %2183 = vmatpush3.bf16.xpose.msra.mxu0 %v973_v59  ;;  %s2882_s30 = sld [smem:[#allocation16_spill]] (!%p2113_p6) }
 0x2a7   : > { %2184 = vmatprep.mubr.msk.bf16.mxu0 %vm2428_vm4, %v2427_v22  ;;  %2194 = vmatprep.subr.bf16.mxu0 %v2427_v22 }
 0x2ad   : > { %2185 = vmatmul.mubr.msk.bf16.vlgmr.msra.gmra.mxu0 %vm919_vm5, %v2652_v50 }
 0x2ae   : > { %2196 = vmatprep.mubr.msk.bf16.mxu0 %vm2428_vm4, %v2427_v22 }
 0x317   : > { %v1066_v60 = vpop.permute.xlu0 %1065 }
 0x318   : > { %v1071_v61 = vsel %vm919_vm5, %v1066_v60, 0  ;;  %v1017_v62 = vpop.permute.xlu1 %1016 }
 0x319   : > { %v1022_v63 = vsel %vm919_vm5, %v1017_v62, 0  ;;  %2195 = vmatpush3.bf16.xpose.msra.mxu0 %v1071_v61 }
 0x31a   : > { %2189 = vmatpush3.bf16.xpose.msra.mxu1 %v1022_v63  ;;  %2206 = vmatprep.subr.bf16.mxu0 %v2427_v22 }
 0x31b   : > { %2200 = vmatprep.subr.bf16.mxu1 %v2427_v22 }
 0x320   : > { %2197 = vmatmul.mubr.msk.bf16.vlgmr.msra.gmra.mxu0 %vm919_vm5, %v2657_v57 }
 0x321   : > { %2191 = vmatmul.mubr.msk.bf16.vlgmr.msra.gmra.mxu1 %vm919_vm5, %v2659_v58  ;;  %2208 = vmatprep.mubr.msk.bf16.mxu0 %vm2428_vm4, %v2427_v22 }
 0x322   : > { %2202 = vmatprep.mubr.msk.bf16.mxu1 %vm2428_vm4, %v2427_v22 }
 0x365   : > { %v960_v1 = vpop.f32.mrf.mxu0 }
 0x366   : > { %v961_v2 = vadd.f32 %v960_v1, %v915_v0 }
 0x367   : > { %v2180_v3 = vpop.f32.mrf.mxu0 }
 0x368   : > { %v1114_v4 = vsel %vm1113_vm6, %v961_v2, -inf }
 0x369   : > { %1115 = vmax.xlane.f32.xlu1 %v1114_v4  ;;  %v963_v5 = vpop.f32.mrf.mxu0 }
 0x36b   : > { %v2181_v6 = vpop.f32.mrf.mxu0 }
 0x36d   : > { %v1009_v9 = vpop.f32.mrf.mxu0 }
 0x36e   : > { %v1010_v10 = vadd.f32 %v1009_v9, %v915_v0 }
 0x36f   : > { %v2186_v11 = vpop.f32.mrf.mxu0 }
 0x370   : > { %v1117_v12 = vsel %vm1113_vm6, %v1010_v10, -inf }
 0x371   : > { %1118 = vmax.xlane.f32.xlu0 %v1117_v12  ;;  %v1012_v13 = vpop.f32.mrf.mxu0 }
 0x373   : > { %v2187_v14 = vpop.f32.mrf.mxu0 }
 0x374   : > { %v2320_v14 = vld [vmem:[%s2572_s26 + $0x8] sm:$0xff]  }
 0x37a   : > { %1162 = vrot.lane.b32.xlu1 %v911_v45, %s2431_s16 }
 0x3e0   : > { %v1107_v15 = vpop.f32.mrf.mxu0 }
 0x3e1   : > { %v1058_v16 = vpop.f32.mrf.mxu1  ;;  %v1108_v20 = vadd.f32 %v1107_v15, %v915_v0 }
 0x3e2   : > { %v1059_v17 = vadd.f32 %v1058_v16, %v915_v0  ;;  %v2198_v18 = vpop.f32.mrf.mxu0  ;;  %v2321_v16 = vld [vmem:[%s2572_s26] sm:$0xff]  }
 0x3e3   : > { %v2192_v19 = vpop.f32.mrf.mxu1  ;;  %v1123_v27 = vsel %vm1113_vm6, %v1108_v20, -inf }
 0x3e4   : > { %v1120_v21 = vsel %vm1113_vm6, %v1059_v17, -inf  ;;  %v1110_v23 = vpop.f32.mrf.mxu0 }
 0x3e5   : > { %v1061_v24 = vpop.f32.mrf.mxu1  ;;  %1121 = vmax.xlane.f32.xlu0 %v1120_v21 }
 0x3e6   : > { %v2199_v25 = vpop.f32.mrf.mxu0 }
 0x3e7   : > { %v2193_v26 = vpop.f32.mrf.mxu1 }
 0x3e9   : > { %1124 = vmax.xlane.f32.xlu0 %v1123_v27 }
 0x3f2   : > { %v1116_v28 = vpop.xlane.xlu1 %1115 }
 0x3f3   : > { %v1126_v29 = vsub.f32 %v961_v2, %v1116_v28 }
 0x3f5   : > { %v1130_v30 = vmul.f32 1.442695, %v1126_v29 }
 0x3f6   : > { %v1163_v31 = vpop.permute.xlu1 %1162 }
 0x3f7   : > { %2336 = vpow2.f32 %v1130_v30  ;;  %v1169_v32 = vsel %vm1167_vm7, %v1163_v31, 0 }
 0x3f8   : > { %2201 = vmatpush3.bf16.msra.mxu1 %v1169_v32 }
 0x3f9   : > { %2212 = vmatprep.subr.bf16.mxu1 %v2427_v22 }
 0x3fa   : > { %v1119_v33 = vpop.xlane.xlu0 %1118 }
 0x3fb   : > { %v1127_v34 = vsub.f32 %v1010_v10, %v1119_v33 }
 0x3fd   : > { %v1132_v35 = vmul.f32 1.442695, %v1127_v34 }
 0x3ff   : > { %2338 = vpow2.f32 %v1132_v35 }
 0x404   : > { %v2337_v36 = vpop.eup %2336 }
 0x405   : > { %v1138_v37 = vsel %vm1113_vm6, %v2337_v36, 0.0 }
 0x406   : > { %1139 = vadd.xlane.f32.xlu1 %v1138_v37 }
 0x40c   : > { %v2339_v38 = vpop.eup %2338 }
 0x40d   : > { %v1141_v39 = vsel %vm1113_vm6, %v2339_v38, 0.0 }
 0x40e   : > { %1142 = vadd.xlane.f32.xlu0 %v1141_v39 }
 0x46e   : > { %v1122_v40 = vpop.xlane.xlu0 %1121 }
 0x46f   : > { %v1128_v41 = vsub.f32 %v1059_v17, %v1122_v40 }
 0x471   : > { %v1134_v42 = vmul.f32 1.442695, %v1128_v41 }
 0x472   : > { %v1125_v43 = vpop.xlane.xlu0 %1124 }
 0x473   : > { %2340 = vpow2.f32 %v1134_v42  ;;  %v1129_v44 = vsub.f32 %v1108_v20, %v1125_v43 }
 0x475   : > { %v1136_v45 = vmul.f32 1.442695, %v1129_v44 }
 0x477   : > { %2342 = vpow2.f32 %v1136_v45 }
 0x480   : > { %v2341_v46 = vpop.eup %2340 }
 0x481   : > { %v1144_v47 = vsel %vm1113_vm6, %v2341_v46, 0.0 }
 0x482   : > { %1145 = vadd.xlane.f32.xlu1 %v1144_v47 }
 0x484   : > { %v2343_v48 = vpop.eup %2342 }
 0x485   : > { %v1147_v49 = vsel %vm1113_vm6, %v2343_v48, 0.0 }
 0x486   : > { %1148 = vadd.xlane.f32.xlu0 %v1147_v49 }
 0x48f   : > { %v1140_v51 = vpop.xlane.xlu1 %1139 }
 0x490   : > { %2344 = vrcp.f32 %v1140_v51 }
 0x493   : > { %1259 = vrot.lane.b32.xlu1 %v2659_v58, %s2431_s16 }
 0x497   : > { %1307 = vrot.lane.b32.xlu1 %v2657_v57, %s2431_s16  ;;  %v1143_v55 = vpop.xlane.xlu0 %1142 }
 0x498   : > { %2346 = vrcp.f32 %v1143_v55 }
 0x49c   : > { %1211 = vrot.lane.b32.xlu0 %v2652_v50, %s2431_s16 }
 0x49d   : > { %v2345_v52 = vpop.eup %2344 }
 0x49e   : > { %v1154_v53 = vmul.f32 %v2345_v52, %v2337_v36  ;;  %v2089_v36 = vld [vmem:[%s2880_s15] ss:$0 sm:$0xff] }
 0x4a0   : > { %v1158_v54 = vpack.c.bf16 %v1154_v53, %v1154_v53 }
 0x4a2   : > { %2203 = vmatmul.mubr.msk.bf16.vlgmr.msra.gmra.mxu1 %vm1113_vm6, %v1158_v54 }
 0x4a3   : > { %2214 = vmatprep.mubr.msk.bf16.mxu1 %vm2428_vm4, %v2427_v22 }
 0x4a5   : > { %v2347_v59 = vpop.eup %2346 }
 0x4a6   : > { %v1155_v50 = vmul.f32 %v2347_v59, %v2339_v38  ;;  %v2323_v59 = vld [vmem:[%s2589_s4] sm:$0xff]  }
 0x4a8   : > { %v1159_v0 = vpack.c.bf16 %v1155_v50, %v1155_v50 }
 0x50b   : > { %v1146_v56 = vpop.xlane.xlu1 %1145 }
 0x50c   : > { %2348 = vrcp.f32 %v1146_v56  ;;  %v2322_v56 = vld [vmem:[%s2589_s4 + $0x8] sm:$0xff]  }
 0x50f   : > { %v1260_v58 = vpop.permute.xlu1 %1259  ;;  %v1149_v60 = vpop.xlane.xlu0 %1148 }
 0x510   : > { %v1265_v57 = vsel %vm1167_vm7, %v1260_v58, 0  ;;  %2350 = vrcp.f32 %v1149_v60 }
 0x511   : > { %2213 = vmatpush3.bf16.msra.mxu1 %v1265_v57 }
 0x512   : > { %2224 = vmatprep.subr.bf16.mxu1 %v2427_v22 }
 0x513   : > { %v1212_v61 = vpop.permute.xlu0 %1211  ;;  %v1308_v63 = vpop.permute.xlu1 %1307 }
 0x514   : > { %v1217_v62 = vsel %vm1167_vm7, %v1212_v61, 0  ;;  %v1313_v1 = vsel %vm1167_vm7, %v1308_v63, 0 }
 0x515   : > { %2207 = vmatpush3.bf16.msra.mxu0 %v1217_v62 }
 0x516   : > { %2218 = vmatprep.subr.bf16.mxu0 %v2427_v22 }
 0x518   : > { %2209 = vmatmul.mubr.msk.bf16.vlgmr.msra.gmra.mxu0 %vm1113_vm6, %v1159_v0 }
 0x519   : > { %v2349_v2 = vpop.eup %2348  ;;  %2219 = vmatpush3.bf16.msra.mxu0 %v1313_v1  ;;  %2220 = vmatprep.mubr.msk.bf16.mxu0 %vm2428_vm4, %v2427_v22  ;;  %v2094_v1 = vld [vmem:[%s743_s14] ss:$0 sm:$0xff] }
 0x51a   : > { %v1156_v3 = vmul.f32 %v2349_v2, %v2341_v46  ;;  %2232 = vmatprep.subr.bf16.mxu0 %v2427_v22 }
 0x51c   : > { %v1160_v4 = vpack.c.bf16 %v1156_v3, %v1156_v3 }
 0x51d   : > { %v2351_v5 = vpop.eup %2350 }
 0x51e   : > { %2215 = vmatmul.mubr.msk.bf16.vlgmr.msra.gmra.mxu1 %vm1113_vm6, %v1160_v4  ;;  %v1157_v6 = vmul.f32 %v2351_v5, %v2343_v48  ;;  %v2095_v5 = vld [vmem:[%s746_s27] ss:$0 sm:$0xff] }
 0x51f   : > { %2228 = vmatprep.mubr.msk.bf16.mxu1 %vm2428_vm4, %v2427_v22  ;;  %2225 = vmatpush3.bf16.msra.mxu1 %v2320_v14  ;;  %v2326_v14 = vld [vmem:[%s2599_s19 + $0x28] sm:$0xff]  }
 0x520   : > { %v1161_v9 = vpack.c.bf16 %v1157_v6, %v1157_v6  ;;  %2226 = vmatprep.subr.bf16.mxu1 %v2427_v22 }
 0x522   : > { %2221 = vmatmul.mubr.msk.bf16.vlgmr.msra.gmra.mxu0 %vm1113_vm6, %v1161_v9 }
 0x523   : > { %2236 = vmatprep.mubr.msk.bf16.mxu0 %vm2428_vm4, %v2427_v22  ;;  %2227 = vmatpush3.bf16.msra.mxu1 %v2321_v16  ;;  %v2328_v16 = vld [vmem:[%s2599_s19 + $0x18] sm:$0xff]  }
 0x524   : > { %2240 = vmatprep.subr.bf16.mxu1 %v2427_v22  ;;  %2233 = vmatpush3.bf16.msra.mxu0 %v2322_v56 }
 0x525   : > { %2234 = vmatprep.subr.bf16.mxu0 %v2427_v22 }
 0x528   : > { %2235 = vmatpush3.bf16.msra.mxu0 %v2323_v59 }
 0x562   : > { %v1205_v10 = vpop.f32.mrf.mxu1 }
 0x564   : > { %v2204_v11 = vpop.f32.mrf.mxu1 }
 0x566   : > { %v1208_v12 = vpop.f32.mrf.mxu1 }
 0x567   : > { %v2324_v12 = vld [vmem:[%s2599_s19 + $0x38] sm:$0xff]  }
 0x568   : > { %v2205_v13 = vpop.f32.mrf.mxu1 }
 0x569   : > { %v2325_v13 = vld [vmem:[%s2599_s19 + $0x30] sm:$0xff]  }
 0x5d8   : > { %v1253_v15 = vpop.f32.mrf.mxu0 }
 0x5da   : > { %v2210_v17 = vpop.f32.mrf.mxu0 }
 0x5db   : > { %v2329_v17 = vld [vmem:[%s2599_s19 + $0x10] sm:$0xff]  }
 0x5dc   : > { %v1256_v18 = vpop.f32.mrf.mxu0 }
 0x5dd   : > { %v2330_v18 = vld [vmem:[%s2599_s19 + $0x8] sm:$0xff]  }
 0x5de   : > { %v2211_v19 = vpop.f32.mrf.mxu0  ;;  %v1301_v20 = vpop.f32.mrf.mxu1 }
 0x5df   : > { %v2331_v19 = vld [vmem:[%s2599_s19] sm:$0xff]  }
 0x5e0   : > { %v2216_v21 = vpop.f32.mrf.mxu1 }
 0x5e2   : > { %v1304_v23 = vpop.f32.mrf.mxu1  ;;  %v1349_v24 = vpop.f32.mrf.mxu0 }
 0x5e3   : > { %v2313_v25 = vpack.i.bf16 %v1349_v24, %v1301_v20  ;;  %v2096_v20 = vld [vmem:[%s754_s6] ss:$0 sm:$0xff] }
 0x5e4   : > { %v2217_v26 = vpop.f32.mrf.mxu1  ;;  %v2222_v27 = vpop.f32.mrf.mxu0 }
 0x5e5   : > { %2314 = vrot.lane.b32.xlu1 %v2313_v25, %s2432_s28 }
 0x5e6   : > { %v1352_v28 = vpop.f32.mrf.mxu0 }
 0x5e8   : > { %v2223_v29 = vpop.f32.mrf.mxu0 }
 0x657   : > { %v2315_v30 = vpop.permute.xlu1 %2314 }
 0x658   : > { %v2317_v31 = vunpack.i.h.bf16 %v2315_v30  ;;  %v2316_v32 = vunpack.i.l.bf16 %v2315_v30 }
 0x65a   : > { %v1364_v33 = vsel %vm919_vm5, %v1253_v15, %v2317_v31  ;;  %v1363_v34 = vsel %vm919_vm5, %v1205_v10, %v2316_v32  ;;  %v2327_v15 = vld [vmem:[%s2599_s19 + $0x20] sm:$0xff]  }
 0x65b   : > { %v2128_v35 = vpack.c.bf16 %v1364_v33, %v1363_v34 }
 0x65d   : > { %2229 = vmatmul.mubr.msk.bf16.vlgmr.msra.gmra.mxu1 %vm785_vm3, %v2128_v35 }
 0x65e   : > { %2256 = vmatprep.mubr.msk.bf16.mxu1 %vm2428_vm4, %v2427_v22  ;;  %2241 = vmatpush3.bf16.msra.mxu1 %v2324_v12 }
 0x65f   : > { %2242 = vmatprep.subr.bf16.mxu1 %v2427_v22 }
 0x662   : > { %2243 = vmatpush3.bf16.msra.mxu1 %v2325_v13 }
 0x663   : > { %2244 = vmatprep.subr.bf16.mxu1 %v2427_v22 }
 0x666   : > { %2245 = vmatpush3.bf16.msra.mxu1 %v2326_v14 }
 0x667   : > { %2246 = vmatprep.subr.bf16.mxu1 %v2427_v22 }
 0x66a   : > { %2247 = vmatpush3.bf16.msra.mxu1 %v2327_v15 }
 0x66b   : > { %2248 = vmatprep.subr.bf16.mxu1 %v2427_v22 }
 0x66e   : > { %2249 = vmatpush3.bf16.msra.mxu1 %v2328_v16 }
 0x66f   : > { %2250 = vmatprep.subr.bf16.mxu1 %v2427_v22 }
 0x672   : > { %2251 = vmatpush3.bf16.msra.mxu1 %v2329_v17 }
 0x673   : > { %2252 = vmatprep.subr.bf16.mxu1 %v2427_v22 }
 0x676   : > { %2253 = vmatpush3.bf16.msra.mxu1 %v2330_v18 }
 0x677   : > { %2254 = vmatprep.subr.bf16.mxu1 %v2427_v22 }
 0x67a   : > { %2255 = vmatpush3.bf16.msra.mxu1 %v2331_v19 }
 0x71d   : > { %v1432_v37 = vpop.f32.mrf.mxu1 }
 0x71e   : > { %v1433_v38 = vadd.f32 %v2089_v36, %v1432_v37 }
 0x71f   : > { %v2230_v39 = vpop.f32.mrf.mxu1 }
 0x720   : > { %v2734_v40 = vadd.f32 %v1433_v38, %v2612_v7 }
 0x721   : > { %v1435_v41 = vpop.f32.mrf.mxu1 }
 0x722   : > { %v1436_v42 = vadd.f32 %v2089_v36, %v1435_v41  ;;  %v1443_v43 = vsel %vm785_vm3, %v2734_v40, 0.0  ;;  %v2103_v41 = vld [vmem:[%s762_s22] ss:$0 sm:$0xff] }
 0x723   : > { %1444 = vadd.xlane.f32.xlu0 %v1443_v43  ;;  %v2231_v44 = vpop.f32.mrf.mxu1 }
 0x724   : > { %v2739_v45 = vadd.f32 %v1436_v42, %v2614_v8 }
 0x726   : > { %v1446_v46 = vsel %vm785_vm3, %v2739_v45, 0.0 }
 0x727   : > { %1447 = vadd.xlane.f32.xlu1 %v1446_v46 }
 0x7ac   : > { %v1445_v47 = vpop.xlane.xlu0 %1444 }
 0x7ad   : > { %v1449_v48 = vmul.f32 0.03125, %v1445_v47 }
 0x7af   : > { %v1451_v7 = vsub.f32 %v2734_v40, %v1449_v48 }
 0x7b0   : > { %v1448_v49 = vpop.xlane.xlu1 %1447 }
 0x7b1   : > { %v1450_v51 = vmul.f32 0.03125, %v1448_v49  ;;  %v1453_v52 = vmul.f32 %v1451_v7, %v1451_v7 }
 0x7b3   : > { %v1452_v53 = vsub.f32 %v2739_v45, %v1450_v51  ;;  %v1455_v54 = vsel %vm785_vm3, %v1453_v52, 0.0 }
 0x7b4   : > { %1456 = vadd.xlane.f32.xlu0 %v1455_v54 }
 0x7b5   : > { %v1454_v55 = vmul.f32 %v1452_v53, %v1452_v53 }
 0x7b7   : > { %v1458_v8 = vsel %vm785_vm3, %v1454_v55, 0.0 }
 0x7b8   : > { %1459 = vadd.xlane.f32.xlu0 %v1458_v8 }
 0x83d   : > { %v1457_v58 = vpop.xlane.xlu0 %1456 }
 0x83e   : > { %v1461_v60 = vmul.f32 0.03125, %v1457_v58 }
 0x840   : > { %v1463_v57 = vadd.f32 1e-05, %v1461_v60 }
 0x841   : > { %v1460_v50 = vpop.xlane.xlu0 %1459 }
 0x842   : > { %2352 = vrsqrt.f32 %v1463_v57  ;;  %v1462_v61 = vmul.f32 0.03125, %v1460_v50 }
 0x844   : > { %v1464_v62 = vadd.f32 1e-05, %v1462_v61 }
 0x846   : > { %2354 = vrsqrt.f32 %v1464_v62 }
 0x84f   : > { %v2353_v63 = vpop.eup %2352 }
 0x850   : > { %v1467_v0 = vmul.f32 %v2353_v63, %v1451_v7 }
 0x852   : > { %v1475_v4 = vmul.f32 %v2094_v1, %v1467_v0 }
 0x853   : > { %v2355_v2 = vpop.eup %2354 }
 0x854   : > { %v1468_v3 = vmul.f32 %v2355_v2, %v1452_v53  ;;  %v1483_v9 = vadd.f32 %v2095_v5, %v1475_v4 }
 0x856   : > { %v1476_v6 = vmul.f32 %v2094_v1, %v1468_v3 }
 0x858   : > { %v1484_v10 = vadd.f32 %v2095_v5, %v1476_v6 }
 0x85a   : > { %v2129_v11 = vpack.c.bf16 %v1484_v10, %v1483_v9 }
 0x85c   : > { %2237 = vmatmul.mubr.msk.bf16.vlgmr.msra.gmra.mxu0 %vm785_vm3, %v2129_v11 }
 0x91c   : > { %v1552_v21 = vpop.f32.mrf.mxu0 }
 0x91d   : > { %v1553_v23 = vadd.f32 %v2096_v20, %v1552_v21 }
 0x91e   : > { %v2238_v24 = vpop.f32.mrf.mxu0 }
 0x91f   : > { %v2101_v25 = vmul.f32 -1.702, %v1553_v23 }
 0x920   : > { %v1555_v26 = vpop.f32.mrf.mxu0 }
 0x921   : > { %v1563_v27 = vmul.f32 1.442695, %v2101_v25  ;;  %v1556_v28 = vadd.f32 %v2096_v20, %v1555_v26 }
 0x922   : > { %v2239_v29 = vpop.f32.mrf.mxu0 }
 0x923   : > { %2356 = vpow2.f32 %v1563_v27  ;;  %v2102_v30 = vmul.f32 -1.702, %v1556_v28 }
 0x925   : > { %v1565_v31 = vmul.f32 1.442695, %v2102_v30 }
 0x927   : > { %2358 = vpow2.f32 %v1565_v31 }
 0x930   : > { %v2357_v22 = vpop.eup %2356 }
 0x931   : > { %v1567_v32 = vadd.f32 1.0, %v2357_v22 }
 0x933   : > { %2360 = vrcp.f32 %v1567_v32 }
 0x934   : > { %v2359_v33 = vpop.eup %2358 }
 0x935   : > { %v1568_v34 = vadd.f32 1.0, %v2359_v33 }
 0x937   : > { %2362 = vrcp.f32 %v1568_v34 }
 0x940   : > { %v2361_v35 = vpop.eup %2360 }
 0x941   : > { %v1573_v37 = vmul.f32 %v2361_v35, %v1553_v23 }
 0x944   : > { %v2363_v36 = vpop.eup %2362 }
 0x945   : > { %v1574_v38 = vmul.f32 %v2363_v36, %v1556_v28 }
 0x947   : > { %v2130_v39 = vpack.c.bf16 %v1574_v38, %v1573_v37 }
 0x949   : > { %2257 = vmatmul.mubr.bf16.vlgmr.msra.gmra.mxu1 %v2130_v39 }
 0xa09   : > { %v1688_v42 = vpop.f32.mrf.mxu1 }
 0xa0a   : > { %v1689_v43 = vadd.f32 %v2103_v41, %v1688_v42 }
 0xa0b   : > { %v2258_v44 = vpop.f32.mrf.mxu1 }
 0xa0c   : > { %v1695_v46 = vadd.f32 %v1689_v43, %v2734_v40 }
 0xa0d   : > { %v1691_v47 = vpop.f32.mrf.mxu1 }
 0xa0e   : > { %1697 = vst.msk [vmem:[#allocation2] sm:$0xff] %vm785_vm3, %v1695_v46  ;;  %v1692_v48 = vadd.f32 %v2103_v41, %v1691_v47  ;;  %1702 = sbr.rel (%p2113_p6) target bundleno = 3284 (0xcd4), region = 96 }
 0xa0f   : > { %v2259_v7 = vpop.f32.mrf.mxu1 }
 0xa10   : > { %v1696_v49 = vadd.f32 %v1692_v48, %v2739_v45 }
 0xa12   : > { %1698 = vst.msk [vmem:[#allocation2 + $0x8] sm:$0xff] %vm785_vm3, %v1696_v49 }
 0xa13   : > { %v1705_v51 = vsel %vm785_vm3, %v1695_v46, 0.0  ;;  %v1708_v52 = vsel %vm785_vm3, %v1696_v49, 0.0  ;;  %v1748_v53 = vlaneseq  ;;  %v1747_v54 = vld [vmem:[%s2881_s23] sm:$0x3]  ;;  %v2364_v2 = vld [vmem:[%s2882_s30 + $0x8] sm:$0xff]   ;;  %v2433_v3 = vmov 0.0  }
 0xa14   : > { %1706 = vadd.xlane.f32.xlu0 %v1705_v51  ;;  %2260 = vmatprep.subr.bf16.mxu0 %v2433_v3  ;;  %v2365_v4 = vld [vmem:[%s2882_s30] sm:$0xff]   ;;  %vm2434_vm8 = vmmov 0   ;;  %vm1788_vm9 = vcmask 1041409   ;;  %vm1847_vm10 = vcmask 254976  }
 0xa15   : > { %v1749_v40 = vshrl.u32 %v1748_v53, 7  ;;  %2261 = vmatpush3.bf16.msra.mxu0 %v2364_v2  ;;  %2264 = vmatprep.mubr.msk.bf16.mxu0 %vm2434_vm8, %v2433_v3  ;;  %v2114_v14 = vld [vmem:[%s2883_s25] ss:$0 sm:$0xff] }
 0xa16   : > { %2262 = vmatprep.subr.bf16.mxu0 %v2433_v3  ;;  %v2115_v16 = vld [vmem:[%s2884_s20] ss:$0 sm:$0xff] }
 0xa17   : > { %v1750_v55 = vsub.s32 0, %v1749_v40  ;;  %v1757_v8 = vsub.s32 1, %v1749_v40 }
 0xa18   : > { %1709 = vadd.xlane.f32.xlu0 %v1708_v52 }
 0xa19   : > { %v1751_v45 = vrot.slane %v1747_v54, %v1750_v55  ;;  %v1758_v56 = vrot.slane %v1747_v54, %v1757_v8  ;;  %2263 = vmatpush3.bf16.msra.mxu0 %v2365_v4 }
 0xa2e   : > { %1753 = vbcast.lane.b32.xlu0 %v1751_v45, 256 }
 0xa9d   : > { %v1707_v59 = vpop.xlane.xlu0 %1706 }
 0xa9e   : > { %v1711_v58 = vmul.f32 0.03125, %v1707_v59 }
 0xaa0   : > { %v1713_v60 = vsub.f32 %v1695_v46, %v1711_v58 }
 0xaa1   : > { %v1710_v57 = vpop.xlane.xlu0 %1709 }
 0xaa2   : > { %v1712_v50 = vmul.f32 0.03125, %v1710_v57  ;;  %v1715_v61 = vmul.f32 %v1713_v60, %v1713_v60 }
 0xaa4   : > { %v1714_v62 = vsub.f32 %v1696_v49, %v1712_v50  ;;  %v1717_v63 = vsel %vm785_vm3, %v1715_v61, 0.0 }
 0xaa5   : > { %1718 = vadd.xlane.f32.xlu1 %v1717_v63  ;;  %v1754_v19 = vpop.permute.xlu0 %1753 }
 0xaa6   : > { %v1716_v0 = vmul.f32 %v1714_v62, %v1714_v62 }
 0xaa8   : > { %v1720_v1 = vsel %vm785_vm3, %v1716_v0, 0.0 }
 0xaa9   : > { %1721 = vadd.xlane.f32.xlu1 %v1720_v1 }
 0xaba   : > { %1760 = vbcast.lane.b32.xlu1 %v1758_v56, 256 }
 0xb2e   : > { %v1719_v5 = vpop.xlane.xlu1 %1718 }
 0xb2f   : > { %v1723_v6 = vmul.f32 0.03125, %v1719_v5 }
 0xb31   : > { %v1725_v9 = vadd.f32 1e-05, %v1723_v6 }
 0xb32   : > { %v1722_v10 = vpop.xlane.xlu1 %1721 }
 0xb33   : > { %2366 = vrsqrt.f32 %v1725_v9  ;;  %v1724_v11 = vmul.f32 0.03125, %v1722_v10 }
 0xb35   : > { %v1726_v12 = vadd.f32 1e-05, %v1724_v11 }
 0xb36   : > { %v1761_v25 = vpop.permute.xlu1 %1760 }
 0xb37   : > { %2368 = vrsqrt.f32 %v1726_v12 }
 0xb40   : > { %v2367_v13 = vpop.eup %2366 }
 0xb41   : > { %v1729_v15 = vmul.f32 %v2367_v13, %v1713_v60 }
 0xb43   : > { %v1737_v17 = vmul.f32 %v2114_v14, %v1729_v15 }
 0xb44   : > { %v2369_v18 = vpop.eup %2368 }
 0xb45   : > { %v1745_v20 = vadd.f32 %v2115_v16, %v1737_v17  ;;  %v1730_v21 = vmul.f32 %v2369_v18, %v1714_v62 }
 0xb47   : > { %v1762_v23 = vmul.f32 %v1754_v19, %v1745_v20  ;;  %v1738_v24 = vmul.f32 %v2114_v14, %v1730_v21 }
 0xb49   : > { %v1764_v26 = vsel %vm785_vm3, %v1762_v23, 0.0  ;;  %v1746_v27 = vadd.f32 %v2115_v16, %v1738_v24 }
 0xb4a   : > { %v1765_v28 = vrot.slane %v1764_v26, 4 }
 0xb4b   : > { %v1763_v29 = vmul.f32 %v1761_v25, %v1746_v27 }
 0xb4c   : > { %v1766_v30 = vadd.f32 %v1765_v28, %v1764_v26 }
 0xb4d   : > { %v1771_v31 = vsel %vm785_vm3, %v1763_v29, 0.0 }
 0xb4e   : > { %v1767_v22 = vrot.slane %v1766_v30, 2  ;;  %v1772_v32 = vrot.slane %v1771_v31, 4 }
 0xb50   : > { %v1768_v33 = vadd.f32 %v1767_v22, %v1766_v30  ;;  %v1773_v34 = vadd.f32 %v1772_v32, %v1771_v31 }
 0xb52   : > { %v1769_v35 = vrot.slane %v1768_v33, 1  ;;  %v1774_v36 = vrot.slane %v1773_v34, 2 }
 0xb54   : > { %v1770_v37 = vadd.f32 %v1769_v35, %v1768_v33  ;;  %v1775_v38 = vadd.f32 %v1774_v36, %v1773_v34 }
 0xb56   : > { %v1776_v39 = vrot.slane %v1775_v38, 1  ;;  %v1778_v41 = vpack.c.bf16 %v1770_v37, %v1770_v37 }
 0xb58   : > { %v1777_v42 = vadd.f32 %v1776_v39, %v1775_v38  ;;  %v1786_v44 = vunpack.c.l.b16 %v1778_v41 }
 0xb5a   : > { %v1779_v43 = vpack.c.bf16 %v1777_v42, %v1777_v42 }
 0xb5c   : > { %v1787_v46 = vunpack.c.l.b16 %v1779_v43 }
 0xb5e   : > { %v1789_v47 = vsel %vm1788_vm9, %v1787_v46, %v1786_v44 }
 0xb5f   : > { %v1790_v48 = vpack.c.b16 %v1789_v47, %v1789_v47 }
 0xb61   : > { %2265 = vmatmul.mubr.msk.bf16.vlgmr.msra.gmra.mxu0 %vm785_vm3, %v1790_v48 }
 0xc21   : > { %v1840_v7 = vpop.f32.mrf.mxu0 }
 0xc22   : > { %v1846_v49 = vmul.f32 %v1840_v7, %v1840_v7 }
 0xc23   : > { %v2266_v51 = vpop.f32.mrf.mxu0 }
 0xc24   : > { %v1848_v52 = vsel %vm1847_vm10, %v1846_v49, 0.0 }
 0xc25   : > { %1849 = vadd.xlane.f32.xlu1 %v1848_v52  ;;  %v1843_v53 = vpop.f32.mrf.mxu0 }
 0xc27   : > { %v2267_v40 = vpop.f32.mrf.mxu0 }
 0xcae   : > { %v1850_v54 = vpop.xlane.xlu1 %1849 }
 0xcaf   : > { %2370 = vrsqrt.f32 %v1850_v54  ;;  %vm1853_vm11 = vcmp.eq.f32.partialorder %v1850_v54, inf  ;;  %v1856_v45 = vand.u32 2147483648, %v1850_v54  ;;  %vm1855_vm12 = vcmp.eq.f32.partialorder %v1850_v54, 0.0 }
 0xcbc   : > { %v2371_v55 = vpop.eup %2370 }
 0xcbd   : > { %v1852_v8 = vmul.f32 %v2371_v55, %v1850_v54 }
 0xcbf   : > { %v1854_v56 = vsel %vm1853_vm11, %v1850_v54, %v1852_v8 }
 0xcc0   : > { %v1857_v59 = vsel %vm1855_vm12, %v1856_v45, %v1854_v56 }
 0xcc1   : > { %v1858_v58 = vmax.f32 %v1857_v59, 1e-12 }
 0xcc3   : > { %2372 = vrcp.f32 %v1858_v58 }
 0xcd0   : > { %v2373_v60 = vpop.eup %2372 }
 0xcd1   : > { %v1860_v57 = vmul.f32 %v2373_v60, %v1840_v7 }
 0xcd3   : > { %1861 = vst.msk [vmem:[#allocation4] sm:$0x3] %vm1847_vm10, %v1860_v57 }
 0xcd4 PF: > { %s2885_s4 = sld [smem:[#allocation8_spill]]  ;;  %s2435_s27 = smov [#allocation4]  }
 0xcd5   : > { %s1871_s6 = sshll.u32 %s2435_s27, 4  ;;  %s1872_s6 = int_to_ptr.vmem [resolvable:$true] %s1871_s6 }
 0xcd6   : > { %s2374_s19 = scalar_lea.vmem %s1872_s6, 32  ;;  %p2381_p11 = scmp.lt.s32.totalorder %s1872_s6, %s1872_s6 }
 0xcd7   : > { %p2375_p8 = scmp.ne.s32.totalorder %s1872_s6, %s2374_s19  ;;  %p2382_p12 = scmp.lt.s32.totalorder %s2374_s19, %s2374_s19 }
 0xcd9   : > { %p2383_p13 = por %p2382_p12, %p2381_p11 }
 0xcda   : > { %s2886_s1 = sadd.s32 4294967295, %s2885_s4  }
 0xcdb   : > { %p2817_p7 = scmp.eq.s32.totalorder %s2886_s1, 1 }
 0xcdd   : > { %p2376_p9 = pnand %p2375_p8, %p2817_p7 }
 0xcdf   : > { %p2377_p10 = pneg %p2376_p9 }
 0xce1   : > { %p2384_p0 = pnand %p2383_p13, %p2377_p10 }
 0xce3   : > { %2387 = shalt.err (!%p2384_p0)
}
 0xce4   : > { %s2888_s23 = sld [smem:[#allocation17_spill]] }
 0xcea   : > { %2269 = dma.vmem_to_hbm [thread:$0]  (%p2817_p7), %s1872_s6, 32, %s2888_s23, [#allocation5]  }
 0xceb   : > { %2411 = dma.done.wait (%p2817_p7), [#allocation5], 32  }
 0xcec   : > { %2413 = vsyncadd (%p2817_p7), [#allocation5], 4294967264 }
 0xced PF: > { %s2889_s24 = sld [smem:[#allocation8_spill]] }
 0xcee   : > { %s2891_s25 = sld [smem:[#allocation9_spill]] }
 0xcf3   : > { %s28_s26 = sadd.s32 1, %s2889_s24   ;;  %s2890_s24 = sld [smem:[#allocation7_spill]] }
 0xcf4   : > { %p25_p1 = scmp.ge.s32.totalorder %s28_s26, 4  }
 0xcf6   :  { %27 = sbr.rel (!%p25_p1) target bundleno = 11 (0xb), region = 163 }
 0xcfb   :  { %1884 = vsyncpa [#allocation5], 1 }
 0xcfc   :  { %1886 = vsyncpa [#allocation5 + $0x1], 1 }

</bundles_post_ra>
